<compile_context>
chip_gen: v7x
topology: tpu7x:2x2x1
jax: 0.10.0
libtpu: 0.0.40
codegen_flags: <defaults>
</compile_context>

<pallas_src>
import functools

import jax
import jax.numpy as jnp
from jax.experimental import pallas as pl
from jax.experimental.pallas import tpu as pltpu


# ----------------------------------------------------------------------------
# Fused Pallas kernel: whole encoder stack for ONE batch element per program.
# ----------------------------------------------------------------------------
def fused_encoder_kernel(
    x_ref,                                   # (S, D)   rows of one batch element
    wqkv_ref, bqkv_ref,                      # (L, D, 3D) bf16 (Q pre-scaled), (L, 1, 3D) f32
    wo_ref, bo_ref,                          # (L, D, D) bf16, (L, 1, D) f32
    w1_ref, b1_ref,                          # (L, D, F) bf16, (L, 1, F) f32
    w2_ref, b2_ref,                          # (L, F, D) bf16, (L, 1, D) f32
    g1_ref, be1_ref, g2_ref, be2_ref,        # (L, 1, D) f32 LayerNorm params
    o_ref,                                   # (S, D)
    *, nhead, num_layers,
):
    S, D = x_ref.shape
    H = nhead
    dh = D // H
    eps = 1e-5

    x = x_ref[...].astype(jnp.float32)       # residual stream, f32

    for l in range(num_layers):              # static unroll (L small at this scale)
        xb = x.astype(jnp.bfloat16)

        # ---- fused QKV projection: ONE (S,D)x(D,3D) matmul ------------------
        qkv = jnp.dot(xb, wqkv_ref[l],
                      preferred_element_type=jnp.float32) + bqkv_ref[l]   # (S, 3D)
        q = qkv[:, 0:D].astype(jnp.bfloat16)
        k = qkv[:, D:2 * D].astype(jnp.bfloat16)
        v = qkv[:, 2 * D:3 * D].astype(jnp.bfloat16)

        # ---- attention core (per head; S x S tiles are tiny) -----------------
        # TODO(synk): collapse the head loop into one batched einsum chain once
        # Mosaic dot_general with multiple/non-leading batch dims is reliable;
        # at H=4, S=8 these unrolled chains are op-count noise vs. the fused matmuls.
        heads = []
        for h in range(H):
            qh = q[:, h * dh:(h + 1) * dh]
            kh = k[:, h * dh:(h + 1) * dh]
            vh = v[:, h * dh:(h + 1) * dh]
            # scale already folded into wq/bq at pack time
            s = jnp.einsum("qd,kd->qk", qh, kh,
                           preferred_element_type=jnp.float32)            # (S, S)
            s = s - jnp.max(s, axis=-1, keepdims=True)
            p = jnp.exp(s)
            p = p * pl.reciprocal(jnp.sum(p, axis=-1, keepdims=True), approx=True)
            heads.append(jnp.dot(p.astype(jnp.bfloat16), vh,
                                 preferred_element_type=jnp.float32))     # (S, dh)

        # Heads contiguous along lanes -> ONE (S,D)x(D,D) output projection.
        attn_in = jnp.concatenate(heads, axis=-1).astype(jnp.bfloat16)    # (S, D)
        attn = jnp.dot(attn_in, wo_ref[l],
                       preferred_element_type=jnp.float32) + bo_ref[l]

        # ---- residual + LayerNorm 1 (post-norm, f32) -------------------------
        y = x + attn
        mu = jnp.mean(y, axis=-1, keepdims=True)
        yc = y - mu
        var = jnp.mean(yc * yc, axis=-1, keepdims=True)
        y = yc * jax.lax.rsqrt(var + eps) * g1_ref[l] + be1_ref[l]

        # ---- feed-forward (ReLU) ---------------------------------------------
        h1 = jnp.dot(y.astype(jnp.bfloat16), w1_ref[l],
                     preferred_element_type=jnp.float32) + b1_ref[l]
        h1 = jnp.maximum(h1, 0.0)
        ff = jnp.dot(h1.astype(jnp.bfloat16), w2_ref[l],
                     preferred_element_type=jnp.float32) + b2_ref[l]

        # ---- residual + LayerNorm 2 --------------------------------------------
        z = y + ff
        mu2 = jnp.mean(z, axis=-1, keepdims=True)
        zc = z - mu2
        var2 = jnp.mean(zc * zc, axis=-1, keepdims=True)
        x = zc * jax.lax.rsqrt(var2 + eps) * g2_ref[l] + be2_ref[l]

    # TODO(synk): for large D write a lane-dense (rows, 128) slab to avoid the
    # masked (D=32 < 128) store; negligible at this size.
    o_ref[...] = x.astype(o_ref.dtype)


# ----------------------------------------------------------------------------
# Wrapper-side parameter packing (pure JAX, free): fused QKV + scale folding.
# ----------------------------------------------------------------------------
def pack_params(layer_params, nhead):
    D = layer_params[0]["wqkv"].shape[0]
    dh = D // nhead
    scale = 1.0 / jnp.sqrt(jnp.float32(dh))

    def per_layer(p):
        # Fold 1/sqrt(dh) into the Q projection (weights AND bias).
        col_scale = jnp.concatenate(
            [jnp.full((D,), scale, jnp.float32), jnp.ones((2 * D,), jnp.float32)], 0)
        wqkv = p["wqkv"] * col_scale[None, :]
        bqkv = p["bqkv"] * col_scale[None, :]
        return {
            "wqkv": wqkv.astype(jnp.bfloat16), "bqkv": bqkv,
            "wo": p["wo"].astype(jnp.bfloat16), "bo": p["bo"],
            "w1": p["w1"].astype(jnp.bfloat16), "b1": p["b1"],
            "w2": p["w2"].astype(jnp.bfloat16), "b2": p["b2"],
            "g1": p["g1"], "be1": p["be1"], "g2": p["g2"], "be2": p["be2"],
        }

    packed = [per_layer(p) for p in layer_params]
    return {k: jnp.stack([q[k] for q in packed], axis=0) for k in packed[0]}


def _full_spec(arr):
    zeros = (0,) * arr.ndim
    return pl.BlockSpec(arr.shape, lambda b, _z=zeros: _z)   # constant -> VMEM resident


def transformer_model_pallas(src, layer_params, nhead):
    """Equivalent of TransformerModel.forward(src); src is (S, B, D)."""
    S, B, D = src.shape
    L = len(layer_params)
    pk = pack_params(layer_params, nhead)

    # Batch-major flat residual stream (B*S, D); the grid axis is the batch.
    x = src.transpose(1, 0, 2).reshape(B * S, D)

    args = (x,
            pk["wqkv"], pk["bqkv"], pk["wo"], pk["bo"],
            pk["w1"], pk["b1"], pk["w2"], pk["b2"],
            pk["g1"], pk["be1"], pk["g2"], pk["be2"])

    in_specs = [pl.BlockSpec((S, D), lambda b: (b, 0))] + [_full_spec(a) for a in args[1:]]

    out = pl.pallas_call(
        functools.partial(fused_encoder_kernel, nhead=nhead, num_layers=L),
        out_shape=jax.ShapeDtypeStruct((B * S, D), src.dtype),
        grid=(B,),
        in_specs=in_specs,
        out_specs=pl.BlockSpec((S, D), lambda b: (b, 0)),
        compiler_params=pltpu.CompilerParams(
            dimension_semantics=("parallel",),          # shards batch across v7x's 2 TCs
            vmem_limit_bytes=32 * 1024 * 1024),
    )(*args)
    return out.reshape(B, S, D).transpose(1, 0, 2)


# ----------------------------------------------------------------------------
# Plain-JAX reference (independent structure: monolithic QKV + 4-D einsums).
# Matmul operands are bf16 (f32 accumulate) to mirror the kernel's MXU precision.
# ----------------------------------------------------------------------------
def _mm(a, b):
    return jnp.dot(a.astype(jnp.bfloat16), b.astype(jnp.bfloat16),
                   preferred_element_type=jnp.float32)


def _layernorm_ref(y, g, b, eps=1e-5):
    mu = jnp.mean(y, axis=-1, keepdims=True)
    var = jnp.mean((y - mu) ** 2, axis=-1, keepdims=True)
    return (y - mu) / jnp.sqrt(var + eps) * g + b


def encoder_layer_ref(x, p, nhead, eps=1e-5):
    S, B, D = x.shape
    dh = D // nhead
    x2 = x.reshape(S * B, D)
    qkv = (_mm(x2, p["wqkv"]) + p["bqkv"]).reshape(S, B, 3, nhead, dh)
    q, k, v = qkv[:, :, 0], qkv[:, :, 1], qkv[:, :, 2]          # (S,B,H,dh)
    s = jnp.einsum("sbhd,tbhd->bhst", q.astype(jnp.bfloat16), k.astype(jnp.bfloat16),
                   preferred_element_type=jnp.float32) / jnp.sqrt(jnp.float32(dh))
    a = jax.nn.softmax(s, axis=-1)
    attn = jnp.einsum("bhst,tbhd->sbhd", a.astype(jnp.bfloat16), v.astype(jnp.bfloat16),
                      preferred_element_type=jnp.float32).reshape(S * B, D)
    attn = _mm(attn, p["wo"]) + p["bo"]
    y = _layernorm_ref(x2 + attn, p["g1"], p["be1"], eps)
    ff = _mm(jnp.maximum(_mm(y, p["w1"]) + p["b1"], 0.0), p["w2"]) + p["b2"]
    z = _layernorm_ref(y + ff, p["g2"], p["be2"], eps)
    return z.reshape(S, B, D)


def transformer_model_ref(x, layer_params, nhead):
    for p in layer_params:
        x = encoder_layer_ref(x, p, nhead)
    return x


# ----------------------------------------------------------------------------
# Deterministic parameter construction (PyTorch-like layout, stored transposed)
# ----------------------------------------------------------------------------
def init_layer_params(key, d_model, dim_feedforward):
    D, F = d_model, dim_feedforward
    ks = jax.random.split(key, 6)
    scale_d = 1.0 / jnp.sqrt(jnp.float32(D))
    scale_f = 1.0 / jnp.sqrt(jnp.float32(F))
    return {
        "wqkv": jax.random.normal(ks[0], (D, 3 * D), jnp.float32) * scale_d,
        "bqkv": jax.random.normal(ks[1], (1, 3 * D), jnp.float32) * 0.02,
        "wo": jax.random.normal(ks[2], (D, D), jnp.float32) * scale_d,
        "bo": jnp.zeros((1, D), jnp.float32),
        "w1": jax.random.normal(ks[3], (D, F), jnp.float32) * scale_d,
        "b1": jax.random.normal(ks[4], (1, F), jnp.float32) * 0.02,
        "w2": jax.random.normal(ks[5], (F, D), jnp.float32) * scale_f,
        "b2": jnp.zeros((1, D), jnp.float32),
        "g1": jnp.ones((1, D), jnp.float32),
        "be1": jnp.zeros((1, D), jnp.float32),
        "g2": jnp.ones((1, D), jnp.float32),
        "be2": jnp.zeros((1, D), jnp.float32),
    }


if __name__ == "__main__":
    # TransformerModel(nhead=4, num_encoder_layers=2, d_model=32,
    #                  dim_feedforward=64, dropout -> identity at inference)
    nhead = 4
    num_encoder_layers = 2
    d_model = 32
    dim_feedforward = 64
    S, B = 8, 2                      # src: (seq, batch, d_model)

    root = jax.random.PRNGKey(0)
    k_x, *k_layers = jax.random.split(root, 1 + num_encoder_layers)
    src = jax.random.normal(k_x, (S, B, d_model), jnp.float32)
    layer_params = [init_layer_params(k, d_model, dim_feedforward)
                    for k in k_layers]

    out = transformer_model_pallas(src, layer_params, nhead)
    out = jax.block_until_ready(out)

    ref = transformer_model_ref(src, layer_params, nhead)
    assert out.shape == (S, B, d_model)
    # Tolerance covers accumulation-order differences, the approx EUP reciprocal
    # in the softmax denominator, and the one-ulp bf16 drift from folding the
    # 1/sqrt(dh) scale into the Q weights; both paths use bf16 matmul operands
    # with f32 accumulation.
    assert jnp.allclose(out, ref, atol=3e-2, rtol=3e-2), "mismatch vs JAX reference"

    print("KERNEL_OK")
</pallas_src>

<mosaic_0001>
module attributes {stable_mosaic.version = 11 : i64} {
  func.func @fused_encoder_kernel(%arg0: i32, %arg1: memref<8x32xf32, #tpu.memory_space<vmem>>, %arg2: memref<2x32x96xbf16, #tpu.memory_space<vmem>>, %arg3: memref<2x1x96xf32, #tpu.memory_space<vmem>>, %arg4: memref<2x32x32xbf16, #tpu.memory_space<vmem>>, %arg5: memref<2x1x32xf32, #tpu.memory_space<vmem>>, %arg6: memref<2x32x64xbf16, #tpu.memory_space<vmem>>, %arg7: memref<2x1x64xf32, #tpu.memory_space<vmem>>, %arg8: memref<2x64x32xbf16, #tpu.memory_space<vmem>>, %arg9: memref<2x1x32xf32, #tpu.memory_space<vmem>>, %arg10: memref<2x1x32xf32, #tpu.memory_space<vmem>>, %arg11: memref<2x1x32xf32, #tpu.memory_space<vmem>>, %arg12: memref<2x1x32xf32, #tpu.memory_space<vmem>>, %arg13: memref<2x1x32xf32, #tpu.memory_space<vmem>>, %arg14: memref<8x32xf32, #tpu.memory_space<vmem>>) attributes {dimension_semantics = [#tpu.dimension_semantics<parallel>], iteration_bounds = array<i64: 2>, scalar_prefetch = 0 : i64, scratch_operands = 0 : i64, tpu.core_type = #tpu.core_type<tc>, window_params = [{transform_indices = @transform_0, window_bounds = array<i64: 8, 32>}, {pipeline_mode = #tpu.pipeline_mode<synchronous>, transform_indices = @transform_1, window_bounds = array<i64: 2, 32, 96>}, {pipeline_mode = #tpu.pipeline_mode<synchronous>, transform_indices = @transform_2, window_bounds = array<i64: 2, 1, 96>}, {pipeline_mode = #tpu.pipeline_mode<synchronous>, transform_indices = @transform_3, window_bounds = array<i64: 2, 32, 32>}, {pipeline_mode = #tpu.pipeline_mode<synchronous>, transform_indices = @transform_4, window_bounds = array<i64: 2, 1, 32>}, {pipeline_mode = #tpu.pipeline_mode<synchronous>, transform_indices = @transform_5, window_bounds = array<i64: 2, 32, 64>}, {pipeline_mode = #tpu.pipeline_mode<synchronous>, transform_indices = @transform_6, window_bounds = array<i64: 2, 1, 64>}, {pipeline_mode = #tpu.pipeline_mode<synchronous>, transform_indices = @transform_7, window_bounds = array<i64: 2, 64, 32>}, {pipeline_mode = #tpu.pipeline_mode<synchronous>, transform_indices = @transform_8, window_bounds = array<i64: 2, 1, 32>}, {pipeline_mode = #tpu.pipeline_mode<synchronous>, transform_indices = @transform_9, window_bounds = array<i64: 2, 1, 32>}, {pipeline_mode = #tpu.pipeline_mode<synchronous>, transform_indices = @transform_10, window_bounds = array<i64: 2, 1, 32>}, {pipeline_mode = #tpu.pipeline_mode<synchronous>, transform_indices = @transform_11, window_bounds = array<i64: 2, 1, 32>}, {pipeline_mode = #tpu.pipeline_mode<synchronous>, transform_indices = @transform_12, window_bounds = array<i64: 2, 1, 32>}, {transform_indices = @transform_13, window_bounds = array<i64: 8, 32>}]} {
    %c0 = arith.constant 0 : index
    %c0_0 = arith.constant 0 : index
    %0 = vector.load %arg1[%c0, %c0_0] : memref<8x32xf32, #tpu.memory_space<vmem>>, vector<8x32xf32>
    %1 = arith.truncf %0 : vector<8x32xf32> to vector<8x32xbf16>
    %c0_1 = arith.constant 0 : index
    %c0_2 = arith.constant 0 : index
    %c0_3 = arith.constant 0 : index
    %2 = vector.load %arg2[%c0_1, %c0_2, %c0_3] : memref<2x32x96xbf16, #tpu.memory_space<vmem>>, vector<1x32x96xbf16>
    %3 = vector.shape_cast %2 : vector<1x32x96xbf16> to vector<32x96xbf16>
    %cst = arith.constant dense<0.000000e+00> : vector<8x96xf32>
    %4 = tpu.matmul %1, %3, %cst {dimension_numbers = #tpu.dot_dimension_numbers<[1], [0], [0], [1], [0, 0, 1, 1], [], []>} : vector<8x32xbf16>, vector<32x96xbf16>, vector<8x96xf32> -> vector<8x96xf32>
    %c0_4 = arith.constant 0 : index
    %c0_5 = arith.constant 0 : index
    %c0_6 = arith.constant 0 : index
    %5 = vector.load %arg3[%c0_4, %c0_5, %c0_6] : memref<2x1x96xf32, #tpu.memory_space<vmem>>, vector<1x1x96xf32>
    %6 = vector.shape_cast %5 : vector<1x1x96xf32> to vector<1x96xf32>
    %7 = vector.broadcast %6 : vector<1x96xf32> to vector<8x96xf32>
    %8 = arith.addf %4, %7 : vector<8x96xf32>
    %9 = vector.extract_strided_slice %8 {offsets = [0, 0], sizes = [8, 32], strides = [1, 1]} : vector<8x96xf32> to vector<8x32xf32>
    %10 = arith.truncf %9 : vector<8x32xf32> to vector<8x32xbf16>
    %11 = vector.extract_strided_slice %8 {offsets = [0, 32], sizes = [8, 32], strides = [1, 1]} : vector<8x96xf32> to vector<8x32xf32>
    %12 = arith.truncf %11 : vector<8x32xf32> to vector<8x32xbf16>
    %13 = vector.extract_strided_slice %8 {offsets = [0, 64], sizes = [8, 32], strides = [1, 1]} : vector<8x96xf32> to vector<8x32xf32>
    %14 = arith.truncf %13 : vector<8x32xf32> to vector<8x32xbf16>
    %15 = vector.extract_strided_slice %10 {offsets = [0, 0], sizes = [8, 8], strides = [1, 1]} : vector<8x32xbf16> to vector<8x8xbf16>
    %16 = vector.extract_strided_slice %12 {offsets = [0, 0], sizes = [8, 8], strides = [1, 1]} : vector<8x32xbf16> to vector<8x8xbf16>
    %17 = vector.extract_strided_slice %14 {offsets = [0, 0], sizes = [8, 8], strides = [1, 1]} : vector<8x32xbf16> to vector<8x8xbf16>
    "tpu.trace_start"() <{level = 10 : i32, message = "qd,kd->qk"}> : () -> ()
    %cst_7 = arith.constant dense<0.000000e+00> : vector<8x8xf32>
    %18 = tpu.matmul %15, %16, %cst_7 {dimension_numbers = #tpu.dot_dimension_numbers<[1], [1], [0], [0], [0, 0, 1, 0], [], []>} : vector<8x8xbf16>, vector<8x8xbf16>, vector<8x8xf32> -> vector<8x8xf32>
    "tpu.trace_stop"() : () -> ()
    %cst_8 = arith.constant dense<0xFF800000> : vector<8xf32>
    %19 = vector.multi_reduction <maximumf>, %18, %cst_8 [1] : vector<8x8xf32> to vector<8xf32>
    %20 = vector.shape_cast %19 : vector<8xf32> to vector<8x1xf32>
    %21 = vector.broadcast %20 : vector<8x1xf32> to vector<8x8xf32>
    %22 = arith.subf %18, %21 : vector<8x8xf32>
    %23 = math.exp %22 : vector<8x8xf32>
    %cst_9 = arith.constant dense<0.000000e+00> : vector<8xf32>
    %24 = vector.multi_reduction <add>, %23, %cst_9 [1] : vector<8x8xf32> to vector<8xf32>
    %25 = vector.shape_cast %24 : vector<8xf32> to vector<8x1xf32>
    %26 = tpu.reciprocal %25 {approx = true} : vector<8x1xf32> -> vector<8x1xf32>
    %27 = vector.broadcast %26 : vector<8x1xf32> to vector<8x8xf32>
    %28 = arith.mulf %23, %27 : vector<8x8xf32>
    %29 = arith.truncf %28 : vector<8x8xf32> to vector<8x8xbf16>
    %cst_10 = arith.constant dense<0.000000e+00> : vector<8x8xf32>
    %30 = tpu.matmul %29, %17, %cst_10 {dimension_numbers = #tpu.dot_dimension_numbers<[1], [0], [0], [1], [0, 0, 1, 1], [], []>} : vector<8x8xbf16>, vector<8x8xbf16>, vector<8x8xf32> -> vector<8x8xf32>
    %31 = vector.extract_strided_slice %10 {offsets = [0, 8], sizes = [8, 8], strides = [1, 1]} : vector<8x32xbf16> to vector<8x8xbf16>
    %32 = vector.extract_strided_slice %12 {offsets = [0, 8], sizes = [8, 8], strides = [1, 1]} : vector<8x32xbf16> to vector<8x8xbf16>
    %33 = vector.extract_strided_slice %14 {offsets = [0, 8], sizes = [8, 8], strides = [1, 1]} : vector<8x32xbf16> to vector<8x8xbf16>
    "tpu.trace_start"() <{level = 10 : i32, message = "qd,kd->qk"}> : () -> ()
    %cst_11 = arith.constant dense<0.000000e+00> : vector<8x8xf32>
    %34 = tpu.matmul %31, %32, %cst_11 {dimension_numbers = #tpu.dot_dimension_numbers<[1], [1], [0], [0], [0, 0, 1, 0], [], []>} : vector<8x8xbf16>, vector<8x8xbf16>, vector<8x8xf32> -> vector<8x8xf32>
    "tpu.trace_stop"() : () -> ()
    %cst_12 = arith.constant dense<0xFF800000> : vector<8xf32>
    %35 = vector.multi_reduction <maximumf>, %34, %cst_12 [1] : vector<8x8xf32> to vector<8xf32>
    %36 = vector.shape_cast %35 : vector<8xf32> to vector<8x1xf32>
    %37 = vector.broadcast %36 : vector<8x1xf32> to vector<8x8xf32>
    %38 = arith.subf %34, %37 : vector<8x8xf32>
    %39 = math.exp %38 : vector<8x8xf32>
    %cst_13 = arith.constant dense<0.000000e+00> : vector<8xf32>
    %40 = vector.multi_reduction <add>, %39, %cst_13 [1] : vector<8x8xf32> to vector<8xf32>
    %41 = vector.shape_cast %40 : vector<8xf32> to vector<8x1xf32>
    %42 = tpu.reciprocal %41 {approx = true} : vector<8x1xf32> -> vector<8x1xf32>
    %43 = vector.broadcast %42 : vector<8x1xf32> to vector<8x8xf32>
    %44 = arith.mulf %39, %43 : vector<8x8xf32>
    %45 = arith.truncf %44 : vector<8x8xf32> to vector<8x8xbf16>
    %cst_14 = arith.constant dense<0.000000e+00> : vector<8x8xf32>
    %46 = tpu.matmul %45, %33, %cst_14 {dimension_numbers = #tpu.dot_dimension_numbers<[1], [0], [0], [1], [0, 0, 1, 1], [], []>} : vector<8x8xbf16>, vector<8x8xbf16>, vector<8x8xf32> -> vector<8x8xf32>
    %47 = vector.extract_strided_slice %10 {offsets = [0, 16], sizes = [8, 8], strides = [1, 1]} : vector<8x32xbf16> to vector<8x8xbf16>
    %48 = vector.extract_strided_slice %12 {offsets = [0, 16], sizes = [8, 8], strides = [1, 1]} : vector<8x32xbf16> to vector<8x8xbf16>
    %49 = vector.extract_strided_slice %14 {offsets = [0, 16], sizes = [8, 8], strides = [1, 1]} : vector<8x32xbf16> to vector<8x8xbf16>
    "tpu.trace_start"() <{level = 10 : i32, message = "qd,kd->qk"}> : () -> ()
    %cst_15 = arith.constant dense<0.000000e+00> : vector<8x8xf32>
    %50 = tpu.matmul %47, %48, %cst_15 {dimension_numbers = #tpu.dot_dimension_numbers<[1], [1], [0], [0], [0, 0, 1, 0], [], []>} : vector<8x8xbf16>, vector<8x8xbf16>, vector<8x8xf32> -> vector<8x8xf32>
    "tpu.trace_stop"() : () -> ()
    %cst_16 = arith.constant dense<0xFF800000> : vector<8xf32>
    %51 = vector.multi_reduction <maximumf>, %50, %cst_16 [1] : vector<8x8xf32> to vector<8xf32>
    %52 = vector.shape_cast %51 : vector<8xf32> to vector<8x1xf32>
    %53 = vector.broadcast %52 : vector<8x1xf32> to vector<8x8xf32>
    %54 = arith.subf %50, %53 : vector<8x8xf32>
    %55 = math.exp %54 : vector<8x8xf32>
    %cst_17 = arith.constant dense<0.000000e+00> : vector<8xf32>
    %56 = vector.multi_reduction <add>, %55, %cst_17 [1] : vector<8x8xf32> to vector<8xf32>
    %57 = vector.shape_cast %56 : vector<8xf32> to vector<8x1xf32>
    %58 = tpu.reciprocal %57 {approx = true} : vector<8x1xf32> -> vector<8x1xf32>
    %59 = vector.broadcast %58 : vector<8x1xf32> to vector<8x8xf32>
    %60 = arith.mulf %55, %59 : vector<8x8xf32>
    %61 = arith.truncf %60 : vector<8x8xf32> to vector<8x8xbf16>
    %cst_18 = arith.constant dense<0.000000e+00> : vector<8x8xf32>
    %62 = tpu.matmul %61, %49, %cst_18 {dimension_numbers = #tpu.dot_dimension_numbers<[1], [0], [0], [1], [0, 0, 1, 1], [], []>} : vector<8x8xbf16>, vector<8x8xbf16>, vector<8x8xf32> -> vector<8x8xf32>
    %63 = vector.extract_strided_slice %10 {offsets = [0, 24], sizes = [8, 8], strides = [1, 1]} : vector<8x32xbf16> to vector<8x8xbf16>
    %64 = vector.extract_strided_slice %12 {offsets = [0, 24], sizes = [8, 8], strides = [1, 1]} : vector<8x32xbf16> to vector<8x8xbf16>
    %65 = vector.extract_strided_slice %14 {offsets = [0, 24], sizes = [8, 8], strides = [1, 1]} : vector<8x32xbf16> to vector<8x8xbf16>
    "tpu.trace_start"() <{level = 10 : i32, message = "qd,kd->qk"}> : () -> ()
    %cst_19 = arith.constant dense<0.000000e+00> : vector<8x8xf32>
    %66 = tpu.matmul %63, %64, %cst_19 {dimension_numbers = #tpu.dot_dimension_numbers<[1], [1], [0], [0], [0, 0, 1, 0], [], []>} : vector<8x8xbf16>, vector<8x8xbf16>, vector<8x8xf32> -> vector<8x8xf32>
    "tpu.trace_stop"() : () -> ()
    %cst_20 = arith.constant dense<0xFF800000> : vector<8xf32>
    %67 = vector.multi_reduction <maximumf>, %66, %cst_20 [1] : vector<8x8xf32> to vector<8xf32>
    %68 = vector.shape_cast %67 : vector<8xf32> to vector<8x1xf32>
    %69 = vector.broadcast %68 : vector<8x1xf32> to vector<8x8xf32>
    %70 = arith.subf %66, %69 : vector<8x8xf32>
    %71 = math.exp %70 : vector<8x8xf32>
    %cst_21 = arith.constant dense<0.000000e+00> : vector<8xf32>
    %72 = vector.multi_reduction <add>, %71, %cst_21 [1] : vector<8x8xf32> to vector<8xf32>
    %73 = vector.shape_cast %72 : vector<8xf32> to vector<8x1xf32>
    %74 = tpu.reciprocal %73 {approx = true} : vector<8x1xf32> -> vector<8x1xf32>
    %75 = vector.broadcast %74 : vector<8x1xf32> to vector<8x8xf32>
    %76 = arith.mulf %71, %75 : vector<8x8xf32>
    %77 = arith.truncf %76 : vector<8x8xf32> to vector<8x8xbf16>
    %cst_22 = arith.constant dense<0.000000e+00> : vector<8x8xf32>
    %78 = tpu.matmul %77, %65, %cst_22 {dimension_numbers = #tpu.dot_dimension_numbers<[1], [0], [0], [1], [0, 0, 1, 1], [], []>} : vector<8x8xbf16>, vector<8x8xbf16>, vector<8x8xf32> -> vector<8x8xf32>
    %79 = tpu.concatenate %30, %46, %62, %78 in 1 : vector<8x8xf32>, vector<8x8xf32>, vector<8x8xf32>, vector<8x8xf32> -> vector<8x32xf32>
    %80 = arith.truncf %79 : vector<8x32xf32> to vector<8x32xbf16>
    %c0_23 = arith.constant 0 : index
    %c0_24 = arith.constant 0 : index
    %c0_25 = arith.constant 0 : index
    %81 = vector.load %arg4[%c0_23, %c0_24, %c0_25] : memref<2x32x32xbf16, #tpu.memory_space<vmem>>, vector<1x32x32xbf16>
    %82 = vector.shape_cast %81 : vector<1x32x32xbf16> to vector<32x32xbf16>
    %cst_26 = arith.constant dense<0.000000e+00> : vector<8x32xf32>
    %83 = tpu.matmul %80, %82, %cst_26 {dimension_numbers = #tpu.dot_dimension_numbers<[1], [0], [0], [1], [0, 0, 1, 1], [], []>} : vector<8x32xbf16>, vector<32x32xbf16>, vector<8x32xf32> -> vector<8x32xf32>
    %c0_27 = arith.constant 0 : index
    %c0_28 = arith.constant 0 : index
    %c0_29 = arith.constant 0 : index
    %84 = vector.load %arg5[%c0_27, %c0_28, %c0_29] : memref<2x1x32xf32, #tpu.memory_space<vmem>>, vector<1x1x32xf32>
    %85 = vector.shape_cast %84 : vector<1x1x32xf32> to vector<1x32xf32>
    %86 = vector.broadcast %85 : vector<1x32xf32> to vector<8x32xf32>
    %87 = arith.addf %83, %86 : vector<8x32xf32>
    %88 = arith.addf %0, %87 : vector<8x32xf32>
    %cst_30 = arith.constant dense<0.000000e+00> : vector<8xf32>
    %89 = vector.multi_reduction <add>, %88, %cst_30 [1] : vector<8x32xf32> to vector<8xf32>
    %90 = vector.shape_cast %89 : vector<8xf32> to vector<8x1xf32>
    %cst_31 = arith.constant 3.200000e+01 : f32
    %91 = vector.broadcast %cst_31 : f32 to vector<8x1xf32>
    %92 = arith.divf %90, %91 : vector<8x1xf32>
    %93 = vector.broadcast %92 : vector<8x1xf32> to vector<8x32xf32>
    %94 = arith.subf %88, %93 : vector<8x32xf32>
    %95 = arith.mulf %94, %94 : vector<8x32xf32>
    %cst_32 = arith.constant dense<0.000000e+00> : vector<8xf32>
    %96 = vector.multi_reduction <add>, %95, %cst_32 [1] : vector<8x32xf32> to vector<8xf32>
    %97 = vector.shape_cast %96 : vector<8xf32> to vector<8x1xf32>
    %cst_33 = arith.constant 3.200000e+01 : f32
    %98 = vector.broadcast %cst_33 : f32 to vector<8x1xf32>
    %99 = arith.divf %97, %98 : vector<8x1xf32>
    %cst_34 = arith.constant 9.99999974E-6 : f32
    %100 = vector.broadcast %cst_34 : f32 to vector<8x1xf32>
    %101 = arith.addf %99, %100 : vector<8x1xf32>
    %102 = math.rsqrt %101 : vector<8x1xf32>
    %103 = vector.broadcast %102 : vector<8x1xf32> to vector<8x32xf32>
    %104 = arith.mulf %94, %103 : vector<8x32xf32>
    %c0_35 = arith.constant 0 : index
    %c0_36 = arith.constant 0 : index
    %c0_37 = arith.constant 0 : index
    %105 = vector.load %arg10[%c0_35, %c0_36, %c0_37] : memref<2x1x32xf32, #tpu.memory_space<vmem>>, vector<1x1x32xf32>
    %106 = vector.shape_cast %105 : vector<1x1x32xf32> to vector<1x32xf32>
    %107 = vector.broadcast %106 : vector<1x32xf32> to vector<8x32xf32>
    %108 = arith.mulf %104, %107 : vector<8x32xf32>
    %c0_38 = arith.constant 0 : index
    %c0_39 = arith.constant 0 : index
    %c0_40 = arith.constant 0 : index
    %109 = vector.load %arg11[%c0_38, %c0_39, %c0_40] : memref<2x1x32xf32, #tpu.memory_space<vmem>>, vector<1x1x32xf32>
    %110 = vector.shape_cast %109 : vector<1x1x32xf32> to vector<1x32xf32>
    %111 = vector.broadcast %110 : vector<1x32xf32> to vector<8x32xf32>
    %112 = arith.addf %108, %111 : vector<8x32xf32>
    %113 = arith.truncf %112 : vector<8x32xf32> to vector<8x32xbf16>
    %c0_41 = arith.constant 0 : index
    %c0_42 = arith.constant 0 : index
    %c0_43 = arith.constant 0 : index
    %114 = vector.load %arg6[%c0_41, %c0_42, %c0_43] : memref<2x32x64xbf16, #tpu.memory_space<vmem>>, vector<1x32x64xbf16>
    %115 = vector.shape_cast %114 : vector<1x32x64xbf16> to vector<32x64xbf16>
    %cst_44 = arith.constant dense<0.000000e+00> : vector<8x64xf32>
    %116 = tpu.matmul %113, %115, %cst_44 {dimension_numbers = #tpu.dot_dimension_numbers<[1], [0], [0], [1], [0, 0, 1, 1], [], []>} : vector<8x32xbf16>, vector<32x64xbf16>, vector<8x64xf32> -> vector<8x64xf32>
    %c0_45 = arith.constant 0 : index
    %c0_46 = arith.constant 0 : index
    %c0_47 = arith.constant 0 : index
    %117 = vector.load %arg7[%c0_45, %c0_46, %c0_47] : memref<2x1x64xf32, #tpu.memory_space<vmem>>, vector<1x1x64xf32>
    %118 = vector.shape_cast %117 : vector<1x1x64xf32> to vector<1x64xf32>
    %119 = vector.broadcast %118 : vector<1x64xf32> to vector<8x64xf32>
    %120 = arith.addf %116, %119 : vector<8x64xf32>
    %cst_48 = arith.constant 0.000000e+00 : f32
    %121 = vector.broadcast %cst_48 : f32 to vector<8x64xf32>
    %122 = arith.maximumf %120, %121 : vector<8x64xf32>
    %123 = arith.truncf %122 : vector<8x64xf32> to vector<8x64xbf16>
    %c0_49 = arith.constant 0 : index
    %c0_50 = arith.constant 0 : index
    %c0_51 = arith.constant 0 : index
    %124 = vector.load %arg8[%c0_49, %c0_50, %c0_51] : memref<2x64x32xbf16, #tpu.memory_space<vmem>>, vector<1x64x32xbf16>
    %125 = vector.shape_cast %124 : vector<1x64x32xbf16> to vector<64x32xbf16>
    %cst_52 = arith.constant dense<0.000000e+00> : vector<8x32xf32>
    %126 = tpu.matmul %123, %125, %cst_52 {dimension_numbers = #tpu.dot_dimension_numbers<[1], [0], [0], [1], [0, 0, 1, 1], [], []>} : vector<8x64xbf16>, vector<64x32xbf16>, vector<8x32xf32> -> vector<8x32xf32>
    %c0_53 = arith.constant 0 : index
    %c0_54 = arith.constant 0 : index
    %c0_55 = arith.constant 0 : index
    %127 = vector.load %arg9[%c0_53, %c0_54, %c0_55] : memref<2x1x32xf32, #tpu.memory_space<vmem>>, vector<1x1x32xf32>
    %128 = vector.shape_cast %127 : vector<1x1x32xf32> to vector<1x32xf32>
    %129 = vector.broadcast %128 : vector<1x32xf32> to vector<8x32xf32>
    %130 = arith.addf %126, %129 : vector<8x32xf32>
    %131 = arith.addf %112, %130 : vector<8x32xf32>
    %cst_56 = arith.constant dense<0.000000e+00> : vector<8xf32>
    %132 = vector.multi_reduction <add>, %131, %cst_56 [1] : vector<8x32xf32> to vector<8xf32>
    %133 = vector.shape_cast %132 : vector<8xf32> to vector<8x1xf32>
    %cst_57 = arith.constant 3.200000e+01 : f32
    %134 = vector.broadcast %cst_57 : f32 to vector<8x1xf32>
    %135 = arith.divf %133, %134 : vector<8x1xf32>
    %136 = vector.broadcast %135 : vector<8x1xf32> to vector<8x32xf32>
    %137 = arith.subf %131, %136 : vector<8x32xf32>
    %138 = arith.mulf %137, %137 : vector<8x32xf32>
    %cst_58 = arith.constant dense<0.000000e+00> : vector<8xf32>
    %139 = vector.multi_reduction <add>, %138, %cst_58 [1] : vector<8x32xf32> to vector<8xf32>
    %140 = vector.shape_cast %139 : vector<8xf32> to vector<8x1xf32>
    %cst_59 = arith.constant 3.200000e+01 : f32
    %141 = vector.broadcast %cst_59 : f32 to vector<8x1xf32>
    %142 = arith.divf %140, %141 : vector<8x1xf32>
    %cst_60 = arith.constant 9.99999974E-6 : f32
    %143 = vector.broadcast %cst_60 : f32 to vector<8x1xf32>
    %144 = arith.addf %142, %143 : vector<8x1xf32>
    %145 = math.rsqrt %144 : vector<8x1xf32>
    %146 = vector.broadcast %145 : vector<8x1xf32> to vector<8x32xf32>
    %147 = arith.mulf %137, %146 : vector<8x32xf32>
    %c0_61 = arith.constant 0 : index
    %c0_62 = arith.constant 0 : index
    %c0_63 = arith.constant 0 : index
    %148 = vector.load %arg12[%c0_61, %c0_62, %c0_63] : memref<2x1x32xf32, #tpu.memory_space<vmem>>, vector<1x1x32xf32>
    %149 = vector.shape_cast %148 : vector<1x1x32xf32> to vector<1x32xf32>
    %150 = vector.broadcast %149 : vector<1x32xf32> to vector<8x32xf32>
    %151 = arith.mulf %147, %150 : vector<8x32xf32>
    %c0_64 = arith.constant 0 : index
    %c0_65 = arith.constant 0 : index
    %c0_66 = arith.constant 0 : index
    %152 = vector.load %arg13[%c0_64, %c0_65, %c0_66] : memref<2x1x32xf32, #tpu.memory_space<vmem>>, vector<1x1x32xf32>
    %153 = vector.shape_cast %152 : vector<1x1x32xf32> to vector<1x32xf32>
    %154 = vector.broadcast %153 : vector<1x32xf32> to vector<8x32xf32>
    %155 = arith.addf %151, %154 : vector<8x32xf32>
    %156 = arith.truncf %155 : vector<8x32xf32> to vector<8x32xbf16>
    %c1 = arith.constant 1 : index
    %c0_67 = arith.constant 0 : index
    %c0_68 = arith.constant 0 : index
    %157 = vector.load %arg2[%c1, %c0_67, %c0_68] : memref<2x32x96xbf16, #tpu.memory_space<vmem>>, vector<1x32x96xbf16>
    %158 = vector.shape_cast %157 : vector<1x32x96xbf16> to vector<32x96xbf16>
    %cst_69 = arith.constant dense<0.000000e+00> : vector<8x96xf32>
    %159 = tpu.matmul %156, %158, %cst_69 {dimension_numbers = #tpu.dot_dimension_numbers<[1], [0], [0], [1], [0, 0, 1, 1], [], []>} : vector<8x32xbf16>, vector<32x96xbf16>, vector<8x96xf32> -> vector<8x96xf32>
    %c1_70 = arith.constant 1 : index
    %c0_71 = arith.constant 0 : index
    %c0_72 = arith.constant 0 : index
    %160 = vector.load %arg3[%c1_70, %c0_71, %c0_72] : memref<2x1x96xf32, #tpu.memory_space<vmem>>, vector<1x1x96xf32>
    %161 = vector.shape_cast %160 : vector<1x1x96xf32> to vector<1x96xf32>
    %162 = vector.broadcast %161 : vector<1x96xf32> to vector<8x96xf32>
    %163 = arith.addf %159, %162 : vector<8x96xf32>
    %164 = vector.extract_strided_slice %163 {offsets = [0, 0], sizes = [8, 32], strides = [1, 1]} : vector<8x96xf32> to vector<8x32xf32>
    %165 = arith.truncf %164 : vector<8x32xf32> to vector<8x32xbf16>
    %166 = vector.extract_strided_slice %163 {offsets = [0, 32], sizes = [8, 32], strides = [1, 1]} : vector<8x96xf32> to vector<8x32xf32>
    %167 = arith.truncf %166 : vector<8x32xf32> to vector<8x32xbf16>
    %168 = vector.extract_strided_slice %163 {offsets = [0, 64], sizes = [8, 32], strides = [1, 1]} : vector<8x96xf32> to vector<8x32xf32>
    %169 = arith.truncf %168 : vector<8x32xf32> to vector<8x32xbf16>
    %170 = vector.extract_strided_slice %165 {offsets = [0, 0], sizes = [8, 8], strides = [1, 1]} : vector<8x32xbf16> to vector<8x8xbf16>
    %171 = vector.extract_strided_slice %167 {offsets = [0, 0], sizes = [8, 8], strides = [1, 1]} : vector<8x32xbf16> to vector<8x8xbf16>
    %172 = vector.extract_strided_slice %169 {offsets = [0, 0], sizes = [8, 8], strides = [1, 1]} : vector<8x32xbf16> to vector<8x8xbf16>
    "tpu.trace_start"() <{level = 10 : i32, message = "qd,kd->qk"}> : () -> ()
    %cst_73 = arith.constant dense<0.000000e+00> : vector<8x8xf32>
    %173 = tpu.matmul %170, %171, %cst_73 {dimension_numbers = #tpu.dot_dimension_numbers<[1], [1], [0], [0], [0, 0, 1, 0], [], []>} : vector<8x8xbf16>, vector<8x8xbf16>, vector<8x8xf32> -> vector<8x8xf32>
    "tpu.trace_stop"() : () -> ()
    %cst_74 = arith.constant dense<0xFF800000> : vector<8xf32>
    %174 = vector.multi_reduction <maximumf>, %173, %cst_74 [1] : vector<8x8xf32> to vector<8xf32>
    %175 = vector.shape_cast %174 : vector<8xf32> to vector<8x1xf32>
    %176 = vector.broadcast %175 : vector<8x1xf32> to vector<8x8xf32>
    %177 = arith.subf %173, %176 : vector<8x8xf32>
    %178 = math.exp %177 : vector<8x8xf32>
    %cst_75 = arith.constant dense<0.000000e+00> : vector<8xf32>
    %179 = vector.multi_reduction <add>, %178, %cst_75 [1] : vector<8x8xf32> to vector<8xf32>
    %180 = vector.shape_cast %179 : vector<8xf32> to vector<8x1xf32>
    %181 = tpu.reciprocal %180 {approx = true} : vector<8x1xf32> -> vector<8x1xf32>
    %182 = vector.broadcast %181 : vector<8x1xf32> to vector<8x8xf32>
    %183 = arith.mulf %178, %182 : vector<8x8xf32>
    %184 = arith.truncf %183 : vector<8x8xf32> to vector<8x8xbf16>
    %cst_76 = arith.constant dense<0.000000e+00> : vector<8x8xf32>
    %185 = tpu.matmul %184, %172, %cst_76 {dimension_numbers = #tpu.dot_dimension_numbers<[1], [0], [0], [1], [0, 0, 1, 1], [], []>} : vector<8x8xbf16>, vector<8x8xbf16>, vector<8x8xf32> -> vector<8x8xf32>
    %186 = vector.extract_strided_slice %165 {offsets = [0, 8], sizes = [8, 8], strides = [1, 1]} : vector<8x32xbf16> to vector<8x8xbf16>
    %187 = vector.extract_strided_slice %167 {offsets = [0, 8], sizes = [8, 8], strides = [1, 1]} : vector<8x32xbf16> to vector<8x8xbf16>
    %188 = vector.extract_strided_slice %169 {offsets = [0, 8], sizes = [8, 8], strides = [1, 1]} : vector<8x32xbf16> to vector<8x8xbf16>
    "tpu.trace_start"() <{level = 10 : i32, message = "qd,kd->qk"}> : () -> ()
    %cst_77 = arith.constant dense<0.000000e+00> : vector<8x8xf32>
    %189 = tpu.matmul %186, %187, %cst_77 {dimension_numbers = #tpu.dot_dimension_numbers<[1], [1], [0], [0], [0, 0, 1, 0], [], []>} : vector<8x8xbf16>, vector<8x8xbf16>, vector<8x8xf32> -> vector<8x8xf32>
    "tpu.trace_stop"() : () -> ()
    %cst_78 = arith.constant dense<0xFF800000> : vector<8xf32>
    %190 = vector.multi_reduction <maximumf>, %189, %cst_78 [1] : vector<8x8xf32> to vector<8xf32>
    %191 = vector.shape_cast %190 : vector<8xf32> to vector<8x1xf32>
    %192 = vector.broadcast %191 : vector<8x1xf32> to vector<8x8xf32>
    %193 = arith.subf %189, %192 : vector<8x8xf32>
    %194 = math.exp %193 : vector<8x8xf32>
    %cst_79 = arith.constant dense<0.000000e+00> : vector<8xf32>
    %195 = vector.multi_reduction <add>, %194, %cst_79 [1] : vector<8x8xf32> to vector<8xf32>
    %196 = vector.shape_cast %195 : vector<8xf32> to vector<8x1xf32>
    %197 = tpu.reciprocal %196 {approx = true} : vector<8x1xf32> -> vector<8x1xf32>
    %198 = vector.broadcast %197 : vector<8x1xf32> to vector<8x8xf32>
    %199 = arith.mulf %194, %198 : vector<8x8xf32>
    %200 = arith.truncf %199 : vector<8x8xf32> to vector<8x8xbf16>
    %cst_80 = arith.constant dense<0.000000e+00> : vector<8x8xf32>
    %201 = tpu.matmul %200, %188, %cst_80 {dimension_numbers = #tpu.dot_dimension_numbers<[1], [0], [0], [1], [0, 0, 1, 1], [], []>} : vector<8x8xbf16>, vector<8x8xbf16>, vector<8x8xf32> -> vector<8x8xf32>
    %202 = vector.extract_strided_slice %165 {offsets = [0, 16], sizes = [8, 8], strides = [1, 1]} : vector<8x32xbf16> to vector<8x8xbf16>
    %203 = vector.extract_strided_slice %167 {offsets = [0, 16], sizes = [8, 8], strides = [1, 1]} : vector<8x32xbf16> to vector<8x8xbf16>
    %204 = vector.extract_strided_slice %169 {offsets = [0, 16], sizes = [8, 8], strides = [1, 1]} : vector<8x32xbf16> to vector<8x8xbf16>
    "tpu.trace_start"() <{level = 10 : i32, message = "qd,kd->qk"}> : () -> ()
    %cst_81 = arith.constant dense<0.000000e+00> : vector<8x8xf32>
    %205 = tpu.matmul %202, %203, %cst_81 {dimension_numbers = #tpu.dot_dimension_numbers<[1], [1], [0], [0], [0, 0, 1, 0], [], []>} : vector<8x8xbf16>, vector<8x8xbf16>, vector<8x8xf32> -> vector<8x8xf32>
    "tpu.trace_stop"() : () -> ()
    %cst_82 = arith.constant dense<0xFF800000> : vector<8xf32>
    %206 = vector.multi_reduction <maximumf>, %205, %cst_82 [1] : vector<8x8xf32> to vector<8xf32>
    %207 = vector.shape_cast %206 : vector<8xf32> to vector<8x1xf32>
    %208 = vector.broadcast %207 : vector<8x1xf32> to vector<8x8xf32>
    %209 = arith.subf %205, %208 : vector<8x8xf32>
    %210 = math.exp %209 : vector<8x8xf32>
    %cst_83 = arith.constant dense<0.000000e+00> : vector<8xf32>
    %211 = vector.multi_reduction <add>, %210, %cst_83 [1] : vector<8x8xf32> to vector<8xf32>
    %212 = vector.shape_cast %211 : vector<8xf32> to vector<8x1xf32>
    %213 = tpu.reciprocal %212 {approx = true} : vector<8x1xf32> -> vector<8x1xf32>
    %214 = vector.broadcast %213 : vector<8x1xf32> to vector<8x8xf32>
    %215 = arith.mulf %210, %214 : vector<8x8xf32>
    %216 = arith.truncf %215 : vector<8x8xf32> to vector<8x8xbf16>
    %cst_84 = arith.constant dense<0.000000e+00> : vector<8x8xf32>
    %217 = tpu.matmul %216, %204, %cst_84 {dimension_numbers = #tpu.dot_dimension_numbers<[1], [0], [0], [1], [0, 0, 1, 1], [], []>} : vector<8x8xbf16>, vector<8x8xbf16>, vector<8x8xf32> -> vector<8x8xf32>
    %218 = vector.extract_strided_slice %165 {offsets = [0, 24], sizes = [8, 8], strides = [1, 1]} : vector<8x32xbf16> to vector<8x8xbf16>
    %219 = vector.extract_strided_slice %167 {offsets = [0, 24], sizes = [8, 8], strides = [1, 1]} : vector<8x32xbf16> to vector<8x8xbf16>
    %220 = vector.extract_strided_slice %169 {offsets = [0, 24], sizes = [8, 8], strides = [1, 1]} : vector<8x32xbf16> to vector<8x8xbf16>
    "tpu.trace_start"() <{level = 10 : i32, message = "qd,kd->qk"}> : () -> ()
    %cst_85 = arith.constant dense<0.000000e+00> : vector<8x8xf32>
    %221 = tpu.matmul %218, %219, %cst_85 {dimension_numbers = #tpu.dot_dimension_numbers<[1], [1], [0], [0], [0, 0, 1, 0], [], []>} : vector<8x8xbf16>, vector<8x8xbf16>, vector<8x8xf32> -> vector<8x8xf32>
    "tpu.trace_stop"() : () -> ()
    %cst_86 = arith.constant dense<0xFF800000> : vector<8xf32>
    %222 = vector.multi_reduction <maximumf>, %221, %cst_86 [1] : vector<8x8xf32> to vector<8xf32>
    %223 = vector.shape_cast %222 : vector<8xf32> to vector<8x1xf32>
    %224 = vector.broadcast %223 : vector<8x1xf32> to vector<8x8xf32>
    %225 = arith.subf %221, %224 : vector<8x8xf32>
    %226 = math.exp %225 : vector<8x8xf32>
    %cst_87 = arith.constant dense<0.000000e+00> : vector<8xf32>
    %227 = vector.multi_reduction <add>, %226, %cst_87 [1] : vector<8x8xf32> to vector<8xf32>
    %228 = vector.shape_cast %227 : vector<8xf32> to vector<8x1xf32>
    %229 = tpu.reciprocal %228 {approx = true} : vector<8x1xf32> -> vector<8x1xf32>
    %230 = vector.broadcast %229 : vector<8x1xf32> to vector<8x8xf32>
    %231 = arith.mulf %226, %230 : vector<8x8xf32>
    %232 = arith.truncf %231 : vector<8x8xf32> to vector<8x8xbf16>
    %cst_88 = arith.constant dense<0.000000e+00> : vector<8x8xf32>
    %233 = tpu.matmul %232, %220, %cst_88 {dimension_numbers = #tpu.dot_dimension_numbers<[1], [0], [0], [1], [0, 0, 1, 1], [], []>} : vector<8x8xbf16>, vector<8x8xbf16>, vector<8x8xf32> -> vector<8x8xf32>
    %234 = tpu.concatenate %185, %201, %217, %233 in 1 : vector<8x8xf32>, vector<8x8xf32>, vector<8x8xf32>, vector<8x8xf32> -> vector<8x32xf32>
    %235 = arith.truncf %234 : vector<8x32xf32> to vector<8x32xbf16>
    %c1_89 = arith.constant 1 : index
    %c0_90 = arith.constant 0 : index
    %c0_91 = arith.constant 0 : index
    %236 = vector.load %arg4[%c1_89, %c0_90, %c0_91] : memref<2x32x32xbf16, #tpu.memory_space<vmem>>, vector<1x32x32xbf16>
    %237 = vector.shape_cast %236 : vector<1x32x32xbf16> to vector<32x32xbf16>
    %cst_92 = arith.constant dense<0.000000e+00> : vector<8x32xf32>
    %238 = tpu.matmul %235, %237, %cst_92 {dimension_numbers = #tpu.dot_dimension_numbers<[1], [0], [0], [1], [0, 0, 1, 1], [], []>} : vector<8x32xbf16>, vector<32x32xbf16>, vector<8x32xf32> -> vector<8x32xf32>
    %c1_93 = arith.constant 1 : index
    %c0_94 = arith.constant 0 : index
    %c0_95 = arith.constant 0 : index
    %239 = vector.load %arg5[%c1_93, %c0_94, %c0_95] : memref<2x1x32xf32, #tpu.memory_space<vmem>>, vector<1x1x32xf32>
    %240 = vector.shape_cast %239 : vector<1x1x32xf32> to vector<1x32xf32>
    %241 = vector.broadcast %240 : vector<1x32xf32> to vector<8x32xf32>
    %242 = arith.addf %238, %241 : vector<8x32xf32>
    %243 = arith.addf %155, %242 : vector<8x32xf32>
    %cst_96 = arith.constant dense<0.000000e+00> : vector<8xf32>
    %244 = vector.multi_reduction <add>, %243, %cst_96 [1] : vector<8x32xf32> to vector<8xf32>
    %245 = vector.shape_cast %244 : vector<8xf32> to vector<8x1xf32>
    %cst_97 = arith.constant 3.200000e+01 : f32
    %246 = vector.broadcast %cst_97 : f32 to vector<8x1xf32>
    %247 = arith.divf %245, %246 : vector<8x1xf32>
    %248 = vector.broadcast %247 : vector<8x1xf32> to vector<8x32xf32>
    %249 = arith.subf %243, %248 : vector<8x32xf32>
    %250 = arith.mulf %249, %249 : vector<8x32xf32>
    %cst_98 = arith.constant dense<0.000000e+00> : vector<8xf32>
    %251 = vector.multi_reduction <add>, %250, %cst_98 [1] : vector<8x32xf32> to vector<8xf32>
    %252 = vector.shape_cast %251 : vector<8xf32> to vector<8x1xf32>
    %cst_99 = arith.constant 3.200000e+01 : f32
    %253 = vector.broadcast %cst_99 : f32 to vector<8x1xf32>
    %254 = arith.divf %252, %253 : vector<8x1xf32>
    %cst_100 = arith.constant 9.99999974E-6 : f32
    %255 = vector.broadcast %cst_100 : f32 to vector<8x1xf32>
    %256 = arith.addf %254, %255 : vector<8x1xf32>
    %257 = math.rsqrt %256 : vector<8x1xf32>
    %258 = vector.broadcast %257 : vector<8x1xf32> to vector<8x32xf32>
    %259 = arith.mulf %249, %258 : vector<8x32xf32>
    %c1_101 = arith.constant 1 : index
    %c0_102 = arith.constant 0 : index
    %c0_103 = arith.constant 0 : index
    %260 = vector.load %arg10[%c1_101, %c0_102, %c0_103] : memref<2x1x32xf32, #tpu.memory_space<vmem>>, vector<1x1x32xf32>
    %261 = vector.shape_cast %260 : vector<1x1x32xf32> to vector<1x32xf32>
    %262 = vector.broadcast %261 : vector<1x32xf32> to vector<8x32xf32>
    %263 = arith.mulf %259, %262 : vector<8x32xf32>
    %c1_104 = arith.constant 1 : index
    %c0_105 = arith.constant 0 : index
    %c0_106 = arith.constant 0 : index
    %264 = vector.load %arg11[%c1_104, %c0_105, %c0_106] : memref<2x1x32xf32, #tpu.memory_space<vmem>>, vector<1x1x32xf32>
    %265 = vector.shape_cast %264 : vector<1x1x32xf32> to vector<1x32xf32>
    %266 = vector.broadcast %265 : vector<1x32xf32> to vector<8x32xf32>
    %267 = arith.addf %263, %266 : vector<8x32xf32>
    %268 = arith.truncf %267 : vector<8x32xf32> to vector<8x32xbf16>
    %c1_107 = arith.constant 1 : index
    %c0_108 = arith.constant 0 : index
    %c0_109 = arith.constant 0 : index
    %269 = vector.load %arg6[%c1_107, %c0_108, %c0_109] : memref<2x32x64xbf16, #tpu.memory_space<vmem>>, vector<1x32x64xbf16>
    %270 = vector.shape_cast %269 : vector<1x32x64xbf16> to vector<32x64xbf16>
    %cst_110 = arith.constant dense<0.000000e+00> : vector<8x64xf32>
    %271 = tpu.matmul %268, %270, %cst_110 {dimension_numbers = #tpu.dot_dimension_numbers<[1], [0], [0], [1], [0, 0, 1, 1], [], []>} : vector<8x32xbf16>, vector<32x64xbf16>, vector<8x64xf32> -> vector<8x64xf32>
    %c1_111 = arith.constant 1 : index
    %c0_112 = arith.constant 0 : index
    %c0_113 = arith.constant 0 : index
    %272 = vector.load %arg7[%c1_111, %c0_112, %c0_113] : memref<2x1x64xf32, #tpu.memory_space<vmem>>, vector<1x1x64xf32>
    %273 = vector.shape_cast %272 : vector<1x1x64xf32> to vector<1x64xf32>
    %274 = vector.broadcast %273 : vector<1x64xf32> to vector<8x64xf32>
    %275 = arith.addf %271, %274 : vector<8x64xf32>
    %cst_114 = arith.constant 0.000000e+00 : f32
    %276 = vector.broadcast %cst_114 : f32 to vector<8x64xf32>
    %277 = arith.maximumf %275, %276 : vector<8x64xf32>
    %278 = arith.truncf %277 : vector<8x64xf32> to vector<8x64xbf16>
    %c1_115 = arith.constant 1 : index
    %c0_116 = arith.constant 0 : index
    %c0_117 = arith.constant 0 : index
    %279 = vector.load %arg8[%c1_115, %c0_116, %c0_117] : memref<2x64x32xbf16, #tpu.memory_space<vmem>>, vector<1x64x32xbf16>
    %280 = vector.shape_cast %279 : vector<1x64x32xbf16> to vector<64x32xbf16>
    %cst_118 = arith.constant dense<0.000000e+00> : vector<8x32xf32>
    %281 = tpu.matmul %278, %280, %cst_118 {dimension_numbers = #tpu.dot_dimension_numbers<[1], [0], [0], [1], [0, 0, 1, 1], [], []>} : vector<8x64xbf16>, vector<64x32xbf16>, vector<8x32xf32> -> vector<8x32xf32>
    %c1_119 = arith.constant 1 : index
    %c0_120 = arith.constant 0 : index
    %c0_121 = arith.constant 0 : index
    %282 = vector.load %arg9[%c1_119, %c0_120, %c0_121] : memref<2x1x32xf32, #tpu.memory_space<vmem>>, vector<1x1x32xf32>
    %283 = vector.shape_cast %282 : vector<1x1x32xf32> to vector<1x32xf32>
    %284 = vector.broadcast %283 : vector<1x32xf32> to vector<8x32xf32>
    %285 = arith.addf %281, %284 : vector<8x32xf32>
    %286 = arith.addf %267, %285 : vector<8x32xf32>
    %cst_122 = arith.constant dense<0.000000e+00> : vector<8xf32>
    %287 = vector.multi_reduction <add>, %286, %cst_122 [1] : vector<8x32xf32> to vector<8xf32>
    %288 = vector.shape_cast %287 : vector<8xf32> to vector<8x1xf32>
    %cst_123 = arith.constant 3.200000e+01 : f32
    %289 = vector.broadcast %cst_123 : f32 to vector<8x1xf32>
    %290 = arith.divf %288, %289 : vector<8x1xf32>
    %291 = vector.broadcast %290 : vector<8x1xf32> to vector<8x32xf32>
    %292 = arith.subf %286, %291 : vector<8x32xf32>
    %293 = arith.mulf %292, %292 : vector<8x32xf32>
    %cst_124 = arith.constant dense<0.000000e+00> : vector<8xf32>
    %294 = vector.multi_reduction <add>, %293, %cst_124 [1] : vector<8x32xf32> to vector<8xf32>
    %295 = vector.shape_cast %294 : vector<8xf32> to vector<8x1xf32>
    %cst_125 = arith.constant 3.200000e+01 : f32
    %296 = vector.broadcast %cst_125 : f32 to vector<8x1xf32>
    %297 = arith.divf %295, %296 : vector<8x1xf32>
    %cst_126 = arith.constant 9.99999974E-6 : f32
    %298 = vector.broadcast %cst_126 : f32 to vector<8x1xf32>
    %299 = arith.addf %297, %298 : vector<8x1xf32>
    %300 = math.rsqrt %299 : vector<8x1xf32>
    %301 = vector.broadcast %300 : vector<8x1xf32> to vector<8x32xf32>
    %302 = arith.mulf %292, %301 : vector<8x32xf32>
    %c1_127 = arith.constant 1 : index
    %c0_128 = arith.constant 0 : index
    %c0_129 = arith.constant 0 : index
    %303 = vector.load %arg12[%c1_127, %c0_128, %c0_129] : memref<2x1x32xf32, #tpu.memory_space<vmem>>, vector<1x1x32xf32>
    %304 = vector.shape_cast %303 : vector<1x1x32xf32> to vector<1x32xf32>
    %305 = vector.broadcast %304 : vector<1x32xf32> to vector<8x32xf32>
    %306 = arith.mulf %302, %305 : vector<8x32xf32>
    %c1_130 = arith.constant 1 : index
    %c0_131 = arith.constant 0 : index
    %c0_132 = arith.constant 0 : index
    %307 = vector.load %arg13[%c1_130, %c0_131, %c0_132] : memref<2x1x32xf32, #tpu.memory_space<vmem>>, vector<1x1x32xf32>
    %308 = vector.shape_cast %307 : vector<1x1x32xf32> to vector<1x32xf32>
    %309 = vector.broadcast %308 : vector<1x32xf32> to vector<8x32xf32>
    %310 = arith.addf %306, %309 : vector<8x32xf32>
    %c0_133 = arith.constant 0 : index
    %c0_134 = arith.constant 0 : index
    %311 = vector.load %arg14[%c0_133, %c0_134] : memref<8x32xf32, #tpu.memory_space<vmem>>, vector<8x32xf32>
    tpu.vector_store %arg14[%c0_133, %c0_134], %310 {strides = array<i32>} : memref<8x32xf32, #tpu.memory_space<vmem>>, vector<8x32xf32>,
    return
  }
  func.func @transform_0(%arg0: i32) -> (i32, i32) {
    %c0_i32 = arith.constant 0 : i32
    %c0_i32_0 = arith.constant 0 : i32
    return %arg0, %c0_i32 : i32, i32
  }
  func.func @transform_1(%arg0: i32) -> (i32, i32, i32) {
    %c0_i32 = arith.constant 0 : i32
    %c0_i32_0 = arith.constant 0 : i32
    %c0_i32_1 = arith.constant 0 : i32
    %c0_i32_2 = arith.constant 0 : i32
    return %c0_i32, %c0_i32_0, %c0_i32_1 : i32, i32, i32
  }
  func.func @transform_2(%arg0: i32) -> (i32, i32, i32) {
    %c0_i32 = arith.constant 0 : i32
    %c0_i32_0 = arith.constant 0 : i32
    %c0_i32_1 = arith.constant 0 : i32
    %c0_i32_2 = arith.constant 0 : i32
    return %c0_i32, %c0_i32_0, %c0_i32_1 : i32, i32, i32
  }
  func.func @transform_3(%arg0: i32) -> (i32, i32, i32) {
    %c0_i32 = arith.constant 0 : i32
    %c0_i32_0 = arith.constant 0 : i32
    %c0_i32_1 = arith.constant 0 : i32
    %c0_i32_2 = arith.constant 0 : i32
    return %c0_i32, %c0_i32_0, %c0_i32_1 : i32, i32, i32
  }
  func.func @transform_4(%arg0: i32) -> (i32, i32, i32) {
    %c0_i32 = arith.constant 0 : i32
    %c0_i32_0 = arith.constant 0 : i32
    %c0_i32_1 = arith.constant 0 : i32
    %c0_i32_2 = arith.constant 0 : i32
    return %c0_i32, %c0_i32_0, %c0_i32_1 : i32, i32, i32
  }
  func.func @transform_5(%arg0: i32) -> (i32, i32, i32) {
    %c0_i32 = arith.constant 0 : i32
    %c0_i32_0 = arith.constant 0 : i32
    %c0_i32_1 = arith.constant 0 : i32
    %c0_i32_2 = arith.constant 0 : i32
    return %c0_i32, %c0_i32_0, %c0_i32_1 : i32, i32, i32
  }
  func.func @transform_6(%arg0: i32) -> (i32, i32, i32) {
    %c0_i32 = arith.constant 0 : i32
    %c0_i32_0 = arith.constant 0 : i32
    %c0_i32_1 = arith.constant 0 : i32
    %c0_i32_2 = arith.constant 0 : i32
    return %c0_i32, %c0_i32_0, %c0_i32_1 : i32, i32, i32
  }
  func.func @transform_7(%arg0: i32) -> (i32, i32, i32) {
    %c0_i32 = arith.constant 0 : i32
    %c0_i32_0 = arith.constant 0 : i32
    %c0_i32_1 = arith.constant 0 : i32
    %c0_i32_2 = arith.constant 0 : i32
    return %c0_i32, %c0_i32_0, %c0_i32_1 : i32, i32, i32
  }
  func.func @transform_8(%arg0: i32) -> (i32, i32, i32) {
    %c0_i32 = arith.constant 0 : i32
    %c0_i32_0 = arith.constant 0 : i32
    %c0_i32_1 = arith.constant 0 : i32
    %c0_i32_2 = arith.constant 0 : i32
    return %c0_i32, %c0_i32_0, %c0_i32_1 : i32, i32, i32
  }
  func.func @transform_9(%arg0: i32) -> (i32, i32, i32) {
    %c0_i32 = arith.constant 0 : i32
    %c0_i32_0 = arith.constant 0 : i32
    %c0_i32_1 = arith.constant 0 : i32
    %c0_i32_2 = arith.constant 0 : i32
    return %c0_i32, %c0_i32_0, %c0_i32_1 : i32, i32, i32
  }
  func.func @transform_10(%arg0: i32) -> (i32, i32, i32) {
    %c0_i32 = arith.constant 0 : i32
    %c0_i32_0 = arith.constant 0 : i32
    %c0_i32_1 = arith.constant 0 : i32
    %c0_i32_2 = arith.constant 0 : i32
    return %c0_i32, %c0_i32_0, %c0_i32_1 : i32, i32, i32
  }
  func.func @transform_11(%arg0: i32) -> (i32, i32, i32) {
    %c0_i32 = arith.constant 0 : i32
    %c0_i32_0 = arith.constant 0 : i32
    %c0_i32_1 = arith.constant 0 : i32
    %c0_i32_2 = arith.constant 0 : i32
    return %c0_i32, %c0_i32_0, %c0_i32_1 : i32, i32, i32
  }
  func.func @transform_12(%arg0: i32) -> (i32, i32, i32) {
    %c0_i32 = arith.constant 0 : i32
    %c0_i32_0 = arith.constant 0 : i32
    %c0_i32_1 = arith.constant 0 : i32
    %c0_i32_2 = arith.constant 0 : i32
    return %c0_i32, %c0_i32_0, %c0_i32_1 : i32, i32, i32
  }
  func.func @transform_13(%arg0: i32) -> (i32, i32) {
    %c0_i32 = arith.constant 0 : i32
    %c0_i32_0 = arith.constant 0 : i32
    return %arg0, %c0_i32 : i32, i32
  }
}

</mosaic_0001>

<bundles_post_ra>
// kernel: tpu_custom_call.1
= control target key start
LH: loop header
LB: loop body
LE: loop exit
PB: predicated region body
PF: predicated region fallthrough
CT: control target
= control target key end

     0   :  { %18 = vsyncpa [#allocation3], 0  ;;  %s3292_s0 = inlined_call_operand.hbm [shape: f32[16,32], index: 0, kind: input, shape index: {}]   ;;  %s3293_s1 = inlined_call_operand.vmem [shape: bf16[2,32,96], index: 1, kind: input, shape index: {}]   ;;  %s3294_s2 = inlined_call_operand.vmem [shape: f32[2,1,96], index: 2, kind: input, shape index: {}]   ;;  %s3295_s3 = inlined_call_operand.vmem [shape: bf16[2,32,32], index: 3, kind: input, shape index: {}]   ;;  %s3296_s4 = inlined_call_operand.vmem [shape: f32[2,1,32], index: 4, kind: input, shape index: {}]   ;;  %s3297_s5 = inlined_call_operand.vmem [shape: bf16[2,32,64], index: 5, kind: input, shape index: {}]   ;;  %s3298_s6 = inlined_call_operand.vmem [shape: f32[2,1,64], index: 6, kind: input, shape index: {}]   ;;  %s3299_s7 = inlined_call_operand.vmem [shape: bf16[2,64,32], index: 7, kind: input, shape index: {}]   ;;  %s3300_s8 = inlined_call_operand.vmem [shape: f32[2,1,32], index: 8, kind: input, shape index: {}]   ;;  %s3301_s9 = inlined_call_operand.vmem [shape: f32[2,1,32], index: 9, kind: input, shape index: {}]   ;;  %s3302_s10 = inlined_call_operand.vmem [shape: f32[2,1,32], index: 10, kind: input, shape index: {}]   ;;  %s3303_s11 = inlined_call_operand.vmem [shape: f32[2,1,32], index: 11, kind: input, shape index: {}]   ;;  %s3304_s12 = inlined_call_operand.vmem [shape: f32[2,1,32], index: 12, kind: input, shape index: {}]   ;;  %s3305_s13 = inlined_call_operand.hbm [shape: f32[16,32], index: 13, kind: output, shape index: {}]  }
   0x1   :  { %20 = vsyncpa [#allocation3 + $0x1], 0 }
   0x2   :  { %21 = vsyncpa [#allocation4], 0 }
   0x3   :  { %23 = vsyncpa [#allocation4 + $0x1], 0  ;;  %s2798_s25 = smov 0   ;;  %s2800_s26 = smov 0  }
   0x4   :  { %s2802_s27 = smov 0   ;;  %s2804_s28 = smov 0  }
   0x5 LB: > { %3323 = sst [smem:[#allocation8_spill]] %s2696_s25  ;;  %s2819_s29 = sadd.s32 4294967295, %s2708_s28   ;;  %s2708_s28 = sphi %s2804_s28, %s3350_s28   ;;  %s2704_s27 = sphi %s2802_s27, %s3352_s27   ;;  %s2700_s26 = sphi %s2800_s26, %s3354_s26   ;;  %s2696_s25 = sphi %s2798_s25, %s3353_s25  }
   0x6   : > { %3324 = sst [smem:[#allocation9_spill]] %s2704_s27  ;;  %s2162_s30 = sadd.s32 4294967294, %s2708_s28  }
   0x7   : > { %s2823_s14 = sadd.s32 1, %s2708_s28   ;;  %s36_s15 = sadd.s32 1, %s2704_s27 }
   0x8   : > { %3325 = sst [smem:[#allocation10_spill]] %s2823_s14  ;;  %s33_s16 = ssub.s32 %s2708_s28, %s2823_s14 }
   0x9   : > { %p43_p0 = scmp.ne.s32.totalorder %s2704_s27, %s2700_s26  ;;  %p34_p1 = scmp.eq.s32.totalorder %s33_s16, 0 }
   0xa   : > { %p44_p2 = scmp.eq.s32.totalorder %s2708_s28, 0  ;;  %p49_p3 = scmp.ne.s32.totalorder %s2700_s26, %s2696_s25 }
   0xb   : > { %p50_p4 = scmp.eq.s32.totalorder %s2819_s29, 0  ;;  %p325_p7 = scmp.eq.s32.totalorder %s2819_s29, 1 }
   0xc   : > { %s2835_s17 = scalar_select %p34_p1, %s2704_s27, %s36_s15  }
   0xd   : > { %p2837_p5 = por %p44_p2, %p43_p0  ;;  %p2841_p6 = por %p50_p4, %p49_p3 }
   0xe   : > { %3326 = sst [smem:[#allocation11_spill]] %s2835_s17  ;;  %p331_p8 = scmp.eq.s32.totalorder %s2162_s30, 1 }
   0xf   : > { %p2502_p10 = scmp.lt.s32.totalorder %s2708_s28, 2  ;;  %p2848_p11 = por %p325_p7, %p43_p0 }
  0x10   : > { %p2852_p12 = por %p331_p8, %p49_p3  ;;  %s387_s22 = sand.u32 1, %s2704_s27  }
  0x11   : > { %s3329_s20 = scalar_select %p2848_p11, 1, 0 }
  0x12   : > { %s3330_s21 = scalar_select %p2852_p12, 1, 0 }
  0x13   : > { %s2166_s23 = sshll.u32 %s2708_s28, 7  ;;  %s2165_s24 = sshll.u32 %s387_s22, 3 }
  0x14   : > { %s2861_s17 = scalar_lea.hbm %s3292_s0, %s2166_s23  ;;  %s391_s30 = scalar_lea.vmem [#allocation2], %s2165_s24 }
  0x15   : > { %s398_s14 = sshll.u32 %s391_s30, 4  ;;  %p2865_p13 = pnand %p2502_p10, %p2837_p5  ;;  %s2869_s14 = int_to_ptr.vmem [resolvable:$true] %s398_s14 }
  0x16   : > { %s388_s15 = scalar_lea.sflag [#allocation3], %s387_s22  ;;  %s2612_s23 = scalar_lea.hbm %s2861_s17, 128 }
  0x17   : > { %p2613_p2 = scmp.ne.s32.totalorder %s2861_s17, %s2612_s23  ;;  %p2614_p3 = pneg %p2865_p13 }
  0x18   : > { %s2617_s16 = scalar_lea.hbm %s3292_s0, 256  ;;  %p2618_p5 = scmp.lt.u32.totalorder %s2861_s17, %s3292_s0 }
  0x19   : > { %p2615_p4 = pnand %p2614_p3, %p2613_p2  ;;  %p2619_p8 = scmp.lt.u32.totalorder %s2617_s16, %s2612_s23 }
  0x1a   : > { %p2621_p9 = scmp.lt.u32.totalorder %s2612_s23, %s2861_s17 }
  0x1b   : > { %p2616_p7 = pneg %p2615_p4  ;;  %p2620_p10 = por %p2619_p8, %p2618_p5 }
  0x1d   : > { %p2622_p0 = por %p2621_p9, %p2620_p10 }
  0x1f   : > { %p2623_p1 = pnand %p2622_p0, %p2616_p7 }
  0x21   : > { %2626 = shalt.err (!%p2623_p1)
}
  0x22   : > { %s2627_s22 = scalar_lea.vmem %s2869_s14, 128  ;;  %s2710_s18 = smov [#allocation2]  }
  0x23   : > { %p2628_p2 = scmp.ne.s32.totalorder %s2869_s14, %s2627_s22  ;;  %s2632_s24 = sshll.u32 %s2710_s18, 4  ;;  %s2633_s24 = int_to_ptr.vmem [resolvable:$false] %s2632_s24 }
  0x24   : > { %s2634_s27 = scalar_lea.vmem %s2633_s24, 256  ;;  %p2635_p11 = scmp.lt.s32.totalorder %s2869_s14, %s2633_s24 }
  0x25   : > { %p2630_p4 = pnand %p2628_p2, %p2614_p3  ;;  %p2636_p5 = scmp.lt.s32.totalorder %s2634_s27, %s2627_s22 }
  0x27   : > { %p2631_p12 = pneg %p2630_p4  ;;  %p2637_p8 = por %p2636_p5, %p2635_p11 }
  0x29   : > { %p2638_p9 = pnand %p2637_p8, %p2631_p12 }
  0x2b   : > { %2641 = shalt.err (!%p2638_p9)
}
  0x2c   : > { %2497 = dma.hbm_to_vmem [thread:$0]  (!%p2865_p13), %s2861_s17, 128, %s2869_s14, %s388_s15  }
  0x2d   : > { %p3332_p0 = scmp.lt.s32.totalorder %s2708_s28, 3  ;;  %p3333_p1 = scmp.ge.s32.totalorder %s2708_s28, 1 }
  0x2f   : > { %p404_p3 = pnand %p3333_p1, %p3332_p0 }
  0x30   : > { %s2903_s23 = sand.u32 (!%p404_p3), 1, %s2700_s26  }
  0x31   : > { %407 = sbr.rel (%p404_p3) target bundleno = 5157 (0x1425), region = 72  ;;  %s3311_s16 = sshll.u32 (!%p404_p3), %s2903_s23, 3 }
  0x32   : > { %s410_s30 = scalar_lea.sflag (!%p404_p3), [#allocation3], %s2903_s23  ;;  %s413_s25 = scalar_lea.vmem (!%p404_p3), [#allocation2], %s3311_s16 }
  0x38   : > { %2687 = dma.done.wait (%p2841_p6), %s410_s30, 128  }
  0x39   : > { %2689 = vsyncadd (%p2841_p6), %s410_s30, 4294967168  ;;  %v2711_v0 = vmov 0.0   ;;  %vm2712_vm0 = vmmov 0   ;;  %v2552_v1 = vld [vmem:[%s3293_s1] sm:$0xff]   ;;  %v2553_v2 = vld [vmem:[%s3293_s1 + $0x8] sm:$0xff]   ;;  %vm482_vm1 = vcmask 261120  }
  0x3a   : > { %2322 = vmatprep.subr.bf16.mxu1 %v2711_v0  ;;  %2326 = vmatprep.mubr.msk.bf16.mxu1 %vm2712_vm0, %v2711_v0  ;;  %v2925_v3 = vld [vmem:[%s413_s25] sm:$0xff]  ;;  %s3322_s24 = smov 120   ;;  %s2714_s27 = smov 96   ;;  %vm530_vm2 = vcmask 64512   ;;  %vm594_vm3 = vcmask 1043456   ;;  %vm981_vm4 = vcmask 130048  }
  0x3b   : > { %2336 = vmatprep.subr.bf16.mxu0 %v2711_v0  ;;  %2338 = vmatprep.mubr.msk.bf16.mxu0 %vm2712_vm0, %v2711_v0  ;;  %v458_v4 = vpack.c.bf16 %v2925_v3, %v2925_v3  ;;  %v2170_v5 = vld [vmem:[%s3294_s2] ss:$0 sm:$0xff]  ;;  %s3317_s30 = smov 80   ;;  %s2716_s25 = smov 88   ;;  %vm983_vm5 = vcmask 195584   ;;  %vm1191_vm6 = vcmask 523264  }
  0x3c   : > { %2323 = vmatpush3.bf16.msra.mxu1 %v2552_v1  ;;  %s3316_s14 = smov 72   ;;  %s2718_s17 = smov 112  }
  0x3d   : > { %2324 = vmatprep.subr.bf16.mxu1 %v2711_v0  ;;  %s3321_s15 = smov 104   ;;  %s3315_s19 = smov 56  }
  0x3e   : > { %s3314_s22 = smov 64   ;;  %s3313_s18 = smov 40  }
  0x3f   : > { %s3312_s16 = smov 48   ;;  %p3346_p11 = scmp.ne.s32.totalorder %s3329_s20, 0 }
  0x40   : > { %2325 = vmatpush3.bf16.msra.mxu1 %v2553_v2 }
  0x41   : > { %2330 = vmatprep.subr.bf16.mxu1 %v2711_v0 }
  0x43   : > { %2327 = vmatmul.mubr.msk.bf16.vlgmr.msra.gmra.mrb[0].mxu1 %vm482_vm1, %v458_v4 }
  0x44   : > { %2332 = vmatprep.mubr.msk.bf16.mxu1 %vm2712_vm0, %v2711_v0 }
 0x116   : > { %v520_v6 = vpop.f32.mrb[0].mxu1 }
 0x117   : > { %v521_v7 = vadd.f32 %v2170_v5, %v520_v6  ;;  %v2328_v8 = vpop.f32.mrb[1].mxu1 }
 0x118   : > { %v523_v9 = vpop.f32.mrb[2].mxu1 }
 0x119   : > { %v2937_v10 = vpack.c.bf16 %v521_v7, %v521_v7  ;;  %v2329_v11 = vpop.f32.mrb[3].mxu1 }
 0x11b   : > { %638 = vrot.lane.b32.xlu1 %v2937_v10, %s3322_s24  ;;  %528 = vrot.lane.b32.xlu0 %v2937_v10, %s2714_s27  ;;  %s3345_s24 = sshll.u32 %s2903_s23, 3 }
 0x11f   : > { %750 = vrot.lane.b32.xlu1 %v2937_v10, %s3317_s30  ;;  %640 = vrot.lane.b32.xlu0 %v2937_v10, %s2716_s25  ;;  %s3319_s30 = smov 16  }
 0x123   : > { %860 = vrot.lane.b32.xlu1 %v2937_v10, %s3316_s14  ;;  %748 = vrot.lane.b32.xlu0 %v2937_v10, %s2718_s17  ;;  %s3334_s14 = smov 120  }
 0x127   : > { %858 = vrot.lane.b32.xlu0 %v2937_v10, %s3321_s15  ;;  %s455_s15 = scalar_lea.vmem [#allocation5], %s3345_s24 }
 0x18d   : > { %v529_v12 = vpop.permute.xlu0 %528  ;;  %v639_v15 = vpop.permute.xlu1 %638 }
 0x18e   : > { %v535_v13 = vsel %vm530_vm2, %v529_v12, 0 }
 0x18f   : > { %2331 = vmatpush3.bf16.xpose.msra.mxu1 %v535_v13 }
 0x190   : > { %2342 = vmatprep.subr.bf16.mxu1 %v2711_v0 }
 0x191   : > { %v641_v14 = vpop.permute.xlu0 %640  ;;  %v751_v17 = vpop.permute.xlu1 %750 }
 0x192   : > { %v646_v16 = vsel %vm530_vm2, %v641_v14, 0  ;;  %v756_v18 = vsel %vm530_vm2, %v751_v17, 0 }
 0x195   : > { %v861_v19 = vpop.permute.xlu1 %860  ;;  %v749_v20 = vpop.permute.xlu0 %748 }
 0x196   : > { %2333 = vmatmul.mubr.msk.bf16.vlgmr.msra.gmra.mrb[4].mxu1 %vm530_vm2, %v2937_v10  ;;  %v866_v21 = vsel %vm530_vm2, %v861_v19, 0 }
 0x197   : > { %2343 = vmatpush3.bf16.xpose.msra.mxu1 %v646_v16  ;;  %2344 = vmatprep.mubr.msk.bf16.mxu1 %vm2712_vm0, %v2711_v0 }
 0x198   : > { %2354 = vmatprep.subr.bf16.mxu1 %v2711_v0 }
 0x199   : > { %v859_v22 = vpop.permute.xlu0 %858 }
 0x19e   : > { %2345 = vmatmul.mubr.msk.bf16.vlgmr.msra.gmra.mrb[8].mxu1 %vm530_vm2, %v639_v15 }
 0x19f   : > { %2355 = vmatpush3.bf16.xpose.msra.mxu1 %v756_v18  ;;  %2356 = vmatprep.mubr.msk.bf16.mxu1 %vm2712_vm0, %v2711_v0 }
 0x1a0   : > { %2366 = vmatprep.subr.bf16.mxu1 %v2711_v0 }
 0x1a6   : > { %2357 = vmatmul.mubr.msk.bf16.vlgmr.msra.gmra.mrb[12].mxu1 %vm530_vm2, %v749_v20 }
 0x1a7   : > { %2367 = vmatpush3.bf16.xpose.msra.mxu1 %v866_v21  ;;  %2368 = vmatprep.mubr.msk.bf16.mxu1 %vm2712_vm0, %v2711_v0 }
 0x1a8   : > { %2378 = vmatprep.subr.bf16.mxu1 %v2711_v0 }
 0x1ae   : > { %2369 = vmatmul.mubr.msk.bf16.vlgmr.msra.gmra.mrb[16].mxu1 %vm530_vm2, %v859_v22 }
 0x1af   : > { %2382 = vmatprep.mubr.msk.bf16.mxu1 %vm2712_vm0, %v2711_v0 }
 0x269   : > { %v571_v23 = vpop.f32.mrb[4].mxu1 }
 0x26a   : > { %v2334_v24 = vpop.f32.mrb[5].mxu1  ;;  %v577_v25 = vsel %vm530_vm2, %v571_v23, -inf }
 0x26b   : > { %578 = vmax.xlane.f32.xlu1 %v577_v25  ;;  %v574_v26 = vpop.f32.mrb[6].mxu1 }
 0x26c   : > { %v2335_v27 = vpop.f32.mrb[7].mxu1 }
 0x271   : > { %v682_v28 = vpop.f32.mrb[8].mxu1 }
 0x272   : > { %v2346_v29 = vpop.f32.mrb[9].mxu1  ;;  %v688_v30 = vsel %vm530_vm2, %v682_v28, -inf }
 0x273   : > { %689 = vmax.xlane.f32.xlu0 %v688_v30  ;;  %v685_v31 = vpop.f32.mrb[10].mxu1 }
 0x274   : > { %v2347_v32 = vpop.f32.mrb[11].mxu1 }
 0x279   : > { %v792_v33 = vpop.f32.mrb[12].mxu1 }
 0x27a   : > { %v2358_v34 = vpop.f32.mrb[13].mxu1  ;;  %v798_v35 = vsel %vm530_vm2, %v792_v33, -inf }
 0x27b   : > { %799 = vmax.xlane.f32.xlu0 %v798_v35  ;;  %v795_v36 = vpop.f32.mrb[14].mxu1  ;;  %v2555_v34 = vld [vmem:[%s3295_s3 + $0x8] sm:$0xff]  }
 0x27c   : > { %v2359_v37 = vpop.f32.mrb[15].mxu1 }
 0x281   : > { %v902_v38 = vpop.f32.mrb[16].mxu1 }
 0x282   : > { %v2370_v39 = vpop.f32.mrb[17].mxu1  ;;  %v908_v40 = vsel %vm530_vm2, %v902_v38, -inf }
 0x283   : > { %909 = vmax.xlane.f32.xlu1 %v908_v40  ;;  %v905_v41 = vpop.f32.mrb[18].mxu1 }
 0x284   : > { %v2371_v42 = vpop.f32.mrb[19].mxu1 }
 0x2f8   : > { %v579_v43 = vpop.xlane.xlu1 %578 }
 0x2f9   : > { %v580_v44 = vsub.f32 %v571_v23, %v579_v43 }
 0x2fb   : > { %v581_v45 = vmul.f32 1.442695, %v580_v44 }
 0x2fd   : > { %2572 = vpow2.f32 %v581_v45 }
 0x300   : > { %v690_v46 = vpop.xlane.xlu0 %689 }
 0x301   : > { %v691_v47 = vsub.f32 %v682_v28, %v690_v46 }
 0x303   : > { %v692_v48 = vmul.f32 1.442695, %v691_v47 }
 0x305   : > { %2574 = vpow2.f32 %v692_v48 }
 0x307   : > { %v2573_v49 = vpop.eup %2572 }
 0x308   : > { %v800_v50 = vpop.xlane.xlu0 %799  ;;  %v583_v51 = vsel %vm530_vm2, %v2573_v49, 0.0 }
 0x309   : > { %v801_v52 = vsub.f32 %v792_v33, %v800_v50  ;;  %584 = vadd.xlane.f32.xlu0 %v583_v51  ;;  %v2554_v33 = vld [vmem:[%s3295_s3] sm:$0xff]  }
 0x30a   : > { %2379 = vmatpush3.bf16.msra.mxu1 %v2554_v33  ;;  %v2182_v50 = vld [vmem:[%s3296_s4] ss:$0 sm:$0xff] }
 0x30b   : > { %v802_v53 = vmul.f32 1.442695, %v801_v52  ;;  %2380 = vmatprep.subr.bf16.mxu1 %v2711_v0 }
 0x30d   : > { %2576 = vpow2.f32 %v802_v53 }
 0x30e   : > { %2381 = vmatpush3.bf16.msra.mxu1 %v2555_v34 }
 0x30f   : > { %v2575_v54 = vpop.eup %2574  ;;  %2394 = vmatprep.subr.bf16.mxu1 %v2711_v0 }
 0x310   : > { %v694_v55 = vsel %vm530_vm2, %v2575_v54, 0.0  ;;  %v910_v58 = vpop.xlane.xlu1 %909 }
 0x311   : > { %695 = vadd.xlane.f32.xlu1 %v694_v55  ;;  %v911_v59 = vsub.f32 %v902_v38, %v910_v58 }
 0x313   : > { %v912_v60 = vmul.f32 1.442695, %v911_v59 }
 0x315   : > { %2578 = vpow2.f32 %v912_v60 }
 0x317   : > { %v2577_v56 = vpop.eup %2576 }
 0x318   : > { %v804_v57 = vsel %vm530_vm2, %v2577_v56, 0.0 }
 0x319   : > { %805 = vadd.xlane.f32.xlu0 %v804_v57 }
 0x31f   : > { %v2579_v61 = vpop.eup %2578 }
 0x320   : > { %v914_v62 = vsel %vm530_vm2, %v2579_v61, 0.0 }
 0x322   : > { %700 = vrot.lane.b32.xlu1 %v2937_v10, %s3315_s19  ;;  %s3335_s19 = smov 104  }
 0x32f   : > { %589 = vrot.lane.b32.xlu0 %v2937_v10, %s3314_s22  ;;  %s3318_s22 = smov 24  }
 0x333   : > { %920 = vrot.lane.b32.xlu0 %v2937_v10, %s3313_s18  ;;  %s3337_s18 = smov 72  }
 0x346   : > { %915 = vadd.xlane.f32.xlu1 %v914_v62 }
 0x357   : > { %810 = vrot.lane.b32.xlu1 %v2937_v10, %s3312_s16  ;;  %s3320_s16 = smov 8  }
 0x396   : > { %v585_v63 = vpop.xlane.xlu0 %584 }
 0x397   : > { %2580 = vrcp.f32 %v585_v63  ;;  %v2556_v63 = vld [vmem:[%s3297_s5] sm:$0xff]  }
 0x39e   : > { %v696_v1 = vpop.xlane.xlu1 %695 }
 0x39f   : > { %2582 = vrcp.f32 %v696_v1  ;;  %v2558_v1 = vld [vmem:[%s3299_s7] sm:$0xff]  }
 0x3a1   : > { %v2581_v2 = vpop.eup %2580 }
 0x3a2   : > { %v587_v5 = vmul.f32 %v2581_v2, %v2573_v49  ;;  %v701_v8 = vpop.permute.xlu1 %700  ;;  %v2559_v2 = vld [vmem:[%s3299_s7 + $0x8] sm:$0xff]  }
 0x3a3   : > { %v706_v12 = vsel %vm594_vm3, %v701_v8, 0  ;;  %v2186_v8 = vld [vmem:[%s3301_s9] ss:$0 sm:$0xff] }
 0x3a4   : > { %v588_v9 = vpack.c.bf16 %v587_v5, %v587_v5 }
 0x3a6   : > { %v806_v4 = vpop.xlane.xlu0 %805 }
 0x3a7   : > { %2584 = vrcp.f32 %v806_v4 }
 0x3a9   : > { %v2583_v11 = vpop.eup %2582 }
 0x3aa   : > { %v590_v6 = vpop.permute.xlu0 %589  ;;  %v698_v10 = vmul.f32 %v2583_v11, %v2575_v54  ;;  %v2187_v11 = vld [vmem:[%s3302_s10] ss:$0 sm:$0xff] }
 0x3ab   : > { %v596_v7 = vsel %vm594_vm3, %v590_v6, 0 }
 0x3ac   : > { %2337 = vmatpush3.bf16.msra.mxu0 %v596_v7  ;;  %v699_v13 = vpack.c.bf16 %v698_v10, %v698_v10 }
 0x3ad   : > { %2348 = vmatprep.subr.bf16.mxu0 %v2711_v0 }
 0x3ae   : > { %v921_v19 = vpop.permute.xlu0 %920 }
 0x3af   : > { %2339 = vmatmul.mubr.msk.bf16.vlgmr.msra.gmra.mrb[0].mxu0 %vm530_vm2, %v588_v9  ;;  %v926_v21 = vsel %vm594_vm3, %v921_v19, 0 }
 0x3b0   : > { %2349 = vmatpush3.bf16.msra.mxu0 %v706_v12  ;;  %2350 = vmatprep.mubr.msk.bf16.mxu0 %vm2712_vm0, %v2711_v0 }
 0x3b1   : > { %2360 = vmatprep.subr.bf16.mxu0 %v2711_v0  ;;  %v2585_v14 = vpop.eup %2584 }
 0x3b2   : > { %v808_v16 = vmul.f32 %v2585_v14, %v2577_v56  ;;  %v2560_v14 = vld [vmem:[%s3299_s7 + $0x10] sm:$0xff]  }
 0x3b4   : > { %v809_v20 = vpack.c.bf16 %v808_v16, %v808_v16  ;;  %v2188_v16 = vld [vmem:[%s3298_s6] ss:$0 sm:$0xff] }
 0x3b7   : > { %2351 = vmatmul.mubr.msk.bf16.vlgmr.msra.gmra.mrb[4].mxu0 %vm530_vm2, %v699_v13 }
 0x3b8   : > { %2362 = vmatprep.mubr.msk.bf16.mxu0 %vm2712_vm0, %v2711_v0 }
 0x3d3   : > { %v916_v15 = vpop.xlane.xlu1 %915 }
 0x3d4   : > { %2586 = vrcp.f32 %v916_v15  ;;  %v2561_v15 = vld [vmem:[%s3299_s7 + $0x18] sm:$0xff]  }
 0x3d7   : > { %v811_v17 = vpop.permute.xlu1 %810 }
 0x3d8   : > { %v816_v18 = vsel %vm594_vm3, %v811_v17, 0 }
 0x3d9   : > { %2361 = vmatpush3.bf16.msra.mxu0 %v816_v18 }
 0x3da   : > { %2372 = vmatprep.subr.bf16.mxu0 %v2711_v0 }
 0x3dc   : > { %2363 = vmatmul.mubr.msk.bf16.vlgmr.msra.gmra.mrb[8].mxu0 %vm530_vm2, %v809_v20 }
 0x3dd   : > { %2373 = vmatpush3.bf16.msra.mxu0 %v926_v21  ;;  %2374 = vmatprep.mubr.msk.bf16.mxu0 %vm2712_vm0, %v2711_v0 }
 0x3de   : > { %v2587_v22 = vpop.eup %2586  ;;  %2386 = vmatprep.subr.bf16.mxu0 %v2711_v0 }
 0x3df   : > { %v918_v23 = vmul.f32 %v2587_v22, %v2579_v61 }
 0x3e1   : > { %v919_v24 = vpack.c.bf16 %v918_v23, %v918_v23 }
 0x3e4   : > { %2375 = vmatmul.mubr.msk.bf16.vlgmr.msra.gmra.mrb[12].mxu0 %vm530_vm2, %v919_v24  ;;  %v2192_v24 = vld [vmem:[%s3300_s8] ss:$0 sm:$0xff] }
 0x3e5   : > { %2390 = vmatprep.mubr.msk.bf16.mxu0 %vm2712_vm0, %v2711_v0  ;;  %2387 = vmatpush3.bf16.msra.mxu0 %v2556_v63 }
 0x3e6   : > { %2388 = vmatprep.subr.bf16.mxu0 %v2711_v0 }
 0x482   : > { %v632_v25 = vpop.f32.mrb[0].mxu0 }
 0x483   : > { %v2340_v26 = vpop.f32.mrb[1].mxu0 }
 0x484   : > { %v635_v27 = vpop.f32.mrb[2].mxu0 }
 0x485   : > { %v2341_v28 = vpop.f32.mrb[3].mxu0 }
 0x48a   : > { %v742_v29 = vpop.f32.mrb[4].mxu0 }
 0x48b   : > { %969 = vrot.lane.b32.xlu1 %v742_v29, %s3320_s16  ;;  %v2352_v30 = vpop.f32.mrb[5].mxu0  ;;  %s3341_s16 = smov 48  }
 0x48c   : > { %v745_v31 = vpop.f32.mrb[6].mxu0 }
 0x48d   : > { %v2353_v32 = vpop.f32.mrb[7].mxu0 }
 0x4af   : > { %v852_v35 = vpop.f32.mrb[8].mxu0 }
 0x4b0   : > { %973 = vrot.lane.b32.xlu0 %v852_v35, %s3319_s30  ;;  %v2364_v36 = vpop.f32.mrb[9].mxu0  ;;  %s3342_s30 = smov 8  }
 0x4b1   : > { %v855_v37 = vpop.f32.mrb[10].mxu0 }
 0x4b2   : > { %v2365_v38 = vpop.f32.mrb[11].mxu0  ;;  %v2562_v37 = vld [vmem:[%s3293_s1 + $0x10] sm:$0xff]  }
 0x4b3   : > { %v2563_v38 = vld [vmem:[%s3293_s1 + $0x18] sm:$0xff]  }
 0x4b7   : > { %v962_v39 = vpop.f32.mrb[12].mxu0 }
 0x4b8   : > { %977 = vrot.lane.b32.xlu1 %v962_v39, %s3318_s22  ;;  %v2376_v40 = vpop.f32.mrb[13].mxu0  ;;  %s3336_s22 = smov 80  }
 0x4b9   : > { %v965_v41 = vpop.f32.mrb[14].mxu0 }
 0x4ba   : > { %v2377_v42 = vpop.f32.mrb[15].mxu0 }
 0x4fd   : > { %v970_v43 = vpop.permute.xlu1 %969 }
 0x4fe   : > { %v980_v45 = vsel %vm530_vm2, %v632_v25, %v970_v43  ;;  %v2198_v43 = vld [vmem:[%s3303_s11] ss:$0 sm:$0xff] }
 0x522   : > { %v974_v44 = vpop.permute.xlu0 %973 }
 0x523   : > { %v982_v46 = vsel %vm981_vm4, %v980_v45, %v974_v44  ;;  %v2199_v45 = vld [vmem:[%s3304_s12] ss:$0 sm:$0xff] }
 0x52a   : > { %v978_v47 = vpop.permute.xlu1 %977 }
 0x52b   : > { %v984_v48 = vsel %vm983_vm5, %v982_v46, %v978_v47 }
 0x52c   : > { %v985_v49 = vpack.c.bf16 %v984_v48, %v984_v48 }
 0x52e   : > { %2383 = vmatmul.mubr.msk.bf16.vlgmr.msra.gmra.mrb[20].mxu1 %vm482_vm1, %v985_v49  ;;  %v2205_v49 = vld [vmem:[%s3294_s2 + $0x1] ss:$0 sm:$0xff] }
 0x52f   : > { %2402 = vmatprep.mubr.msk.bf16.mxu1 %vm2712_vm0, %v2711_v0  ;;  %2395 = vmatpush3.bf16.msra.mxu1 %v2558_v1 }
 0x530   : > { %2396 = vmatprep.subr.bf16.mxu1 %v2711_v0 }
 0x533   : > { %2397 = vmatpush3.bf16.msra.mxu1 %v2559_v2 }
 0x534   : > { %2398 = vmatprep.subr.bf16.mxu1 %v2711_v0 }
 0x537   : > { %2399 = vmatpush3.bf16.msra.mxu1 %v2560_v14 }
 0x538   : > { %2400 = vmatprep.subr.bf16.mxu1 %v2711_v0 }
 0x53b   : > { %2401 = vmatpush3.bf16.msra.mxu1 %v2561_v15 }
 0x53c   : > { %2420 = vmatprep.subr.bf16.mxu1 %v2711_v0 }
 0x601   : > { %v1046_v51 = vpop.f32.mrb[20].mxu1 }
 0x602   : > { %v1047_v52 = vadd.f32 %v2182_v50, %v1046_v51  ;;  %v2384_v53 = vpop.f32.mrb[21].mxu1 }
 0x603   : > { %v1049_v54 = vpop.f32.mrb[22].mxu1 }
 0x604   : > { %v2385_v55 = vpop.f32.mrb[23].mxu1  ;;  %v1052_v56 = vadd.f32 %v1047_v52, %v2925_v3  ;;  %v2557_v3 = vld [vmem:[%s3297_s5 + $0x8] sm:$0xff]  }
 0x605   : > { %2389 = vmatpush3.bf16.msra.mxu0 %v2557_v3 }
 0x606   : > { %v1053_v57 = vsel %vm482_vm1, %v1052_v56, 0.0  ;;  %2406 = vmatprep.subr.bf16.mxu0 %v2711_v0 }
 0x607   : > { %1054 = vadd.xlane.f32.xlu0 %v1053_v57 }
 0x694   : > { %v1055_v58 = vpop.xlane.xlu0 %1054 }
 0x695   : > { %v1057_v59 = vmul.f32 0.03125, %v1055_v58 }
 0x697   : > { %v1058_v60 = vsub.f32 %v1052_v56, %v1057_v59 }
 0x699   : > { %v1059_v61 = vmul.f32 %v1058_v60, %v1058_v60 }
 0x69b   : > { %v1060_v62 = vsel %vm482_vm1, %v1059_v61, 0.0 }
 0x69c   : > { %1061 = vadd.xlane.f32.xlu1 %v1060_v62 }
 0x729   : > { %v1062_v4 = vpop.xlane.xlu1 %1061 }
 0x72a   : > { %v1063_v5 = vmul.f32 0.03125, %v1062_v4 }
 0x72c   : > { %v1064_v6 = vadd.f32 1e-05, %v1063_v5 }
 0x72e   : > { %2588 = vrsqrt.f32 %v1064_v6 }
 0x738   : > { %v2589_v7 = vpop.eup %2588 }
 0x739   : > { %v1066_v9 = vmul.f32 %v2589_v7, %v1058_v60 }
 0x73b   : > { %v1074_v12 = vmul.f32 %v2186_v8, %v1066_v9 }
 0x73d   : > { %v1082_v10 = vadd.f32 %v2187_v11, %v1074_v12 }
 0x73f   : > { %v1083_v13 = vpack.c.bf16 %v1082_v10, %v1082_v10 }
 0x741   : > { %2391 = vmatmul.mubr.msk.bf16.vlgmr.msra.gmra.mrb[16].mxu0 %vm482_vm1, %v1083_v13 }
 0x742   : > { %2410 = vmatprep.mubr.msk.bf16.mxu0 %vm2712_vm0, %v2711_v0  ;;  %2407 = vmatpush3.bf16.msra.mxu0 %v2562_v37 }
 0x743   : > { %2408 = vmatprep.subr.bf16.mxu0 %v2711_v0 }
 0x746   : > { %2409 = vmatpush3.bf16.msra.mxu0 %v2563_v38 }
 0x747   : > { %2414 = vmatprep.subr.bf16.mxu0 %v2711_v0 }
 0x814   : > { %v1144_v17 = vpop.f32.mrb[16].mxu0 }
 0x815   : > { %v1145_v18 = vadd.f32 %v2188_v16, %v1144_v17  ;;  %v2392_v19 = vpop.f32.mrb[17].mxu0 }
 0x816   : > { %v1147_v20 = vpop.f32.mrb[18].mxu0 }
 0x817   : > { %v1150_v21 = vmax.f32 %v1145_v18, 0.0  ;;  %v2393_v22 = vpop.f32.mrb[19].mxu0 }
 0x819   : > { %v1151_v23 = vpack.c.bf16 %v1150_v21, %v1150_v21 }
 0x81b   : > { %2403 = vmatmul.mubr.msk.bf16.vlgmr.msra.gmra.mrb[24].mxu1 %vm1191_vm6, %v1151_v23 }
 0x81c   : > { %2422 = vmatprep.mubr.msk.bf16.mxu1 %vm2712_vm0, %v2711_v0 }
 0x8ee   : > { %v1229_v25 = vpop.f32.mrb[24].mxu1 }
 0x8ef   : > { %v1230_v26 = vadd.f32 %v2192_v24, %v1229_v25  ;;  %v2404_v27 = vpop.f32.mrb[25].mxu1 }
 0x8f0   : > { %v1232_v28 = vpop.f32.mrb[26].mxu1 }
 0x8f1   : > { %v2405_v29 = vpop.f32.mrb[27].mxu1  ;;  %v1235_v30 = vadd.f32 %v1230_v26, %v1082_v10 }
 0x8f3   : > { %v1236_v31 = vsel %vm482_vm1, %v1235_v30, 0.0 }
 0x8f4   : > { %1237 = vadd.xlane.f32.xlu0 %v1236_v31 }
 0x981   : > { %v1238_v32 = vpop.xlane.xlu0 %1237 }
 0x982   : > { %v1239_v33 = vmul.f32 0.03125, %v1238_v32 }
 0x984   : > { %v1240_v34 = vsub.f32 %v1235_v30, %v1239_v33 }
 0x986   : > { %v1241_v35 = vmul.f32 %v1240_v34, %v1240_v34 }
 0x988   : > { %v1242_v36 = vsel %vm482_vm1, %v1241_v35, 0.0 }
 0x989   : > { %1243 = vadd.xlane.f32.xlu0 %v1242_v36 }
 0xa16   : > { %v1244_v39 = vpop.xlane.xlu0 %1243 }
 0xa17   : > { %v1245_v40 = vmul.f32 0.03125, %v1244_v39 }
 0xa19   : > { %v1246_v41 = vadd.f32 1e-05, %v1245_v40 }
 0xa1b   : > { %2590 = vrsqrt.f32 %v1246_v41 }
 0xa25   : > { %v2591_v42 = vpop.eup %2590 }
 0xa26   : > { %v1248_v44 = vmul.f32 %v2591_v42, %v1240_v34 }
 0xa28   : > { %v1256_v46 = vmul.f32 %v2198_v43, %v1248_v44 }
 0xa2a   : > { %v3091_v47 = vadd.f32 %v2199_v45, %v1256_v46 }
 0xa2c   : > { %v1265_v48 = vpack.c.bf16 %v3091_v47, %v3091_v47 }
 0xa2e   : > { %2411 = vmatmul.mubr.msk.bf16.vlgmr.msra.gmra.mrb[20].mxu0 %vm482_vm1, %v1265_v48 }
 0xa2f   : > { %2416 = vmatprep.mubr.msk.bf16.mxu0 %vm2712_vm0, %v2711_v0 }
 0xb01   : > { %v1328_v50 = vpop.f32.mrb[20].mxu0 }
 0xb02   : > { %v1329_v51 = vadd.f32 %v2205_v49, %v1328_v50  ;;  %v2412_v52 = vpop.f32.mrb[21].mxu0 }
 0xb03   : > { %v1331_v53 = vpop.f32.mrb[22].mxu0 }
 0xb04   : > { %v3101_v54 = vpack.c.bf16 %v1329_v51, %v1329_v51  ;;  %v2413_v55 = vpop.f32.mrb[23].mxu0 }
 0xb06   : > { %1446 = vrot.lane.b32.xlu0 %v3101_v54, %s2716_s25  ;;  %1336 = vrot.lane.b32.xlu1 %v3101_v54, %s2714_s27  ;;  %s3338_s27 = smov 56   ;;  %s3339_s25 = smov 64  }
 0xb0a   : > { %1554 = vrot.lane.b32.xlu0 %v3101_v54, %s2718_s17  ;;  %1444 = vrot.lane.b32.xlu1 %v3101_v54, %s3334_s14  ;;  %s3340_s17 = smov 40   ;;  %s2092_s14 = sshll.u32 %s455_s15, 4  ;;  %s3249_s14 = int_to_ptr.vmem [resolvable:$true] %s2092_s14 }
 0xb0e   : > { %1664 = vrot.lane.b32.xlu0 %v3101_v54, %s3335_s19  ;;  %1556 = vrot.lane.b32.xlu1 %v3101_v54, %s3336_s22  ;;  %s3343_s22 = smov 16  }
 0xb12   : > { %1666 = vrot.lane.b32.xlu1 %v3101_v54, %s3337_s18  ;;  %s3344_s18 = smov 24  }
 0xb78   : > { %v1337_v56 = vpop.permute.xlu1 %1336  ;;  %v1447_v58 = vpop.permute.xlu0 %1446 }
 0xb79   : > { %v1342_v57 = vsel %vm530_vm2, %v1337_v56, 0  ;;  %v1452_v60 = vsel %vm530_vm2, %v1447_v58, 0 }
 0xb7a   : > { %2415 = vmatpush3.bf16.xpose.msra.mxu0 %v1342_v57 }
 0xb7b   : > { %2426 = vmatprep.subr.bf16.mxu0 %v2711_v0 }
 0xb7c   : > { %v1445_v59 = vpop.permute.xlu1 %1444  ;;  %v1555_v3 = vpop.permute.xlu0 %1554 }
 0xb80   : > { %v1557_v61 = vpop.permute.xlu1 %1556  ;;  %v1665_v2 = vpop.permute.xlu0 %1664 }
 0xb81   : > { %2417 = vmatmul.mubr.msk.bf16.vlgmr.msra.gmra.mrb[24].mxu0 %vm530_vm2, %v3101_v54  ;;  %v1562_v62 = vsel %vm530_vm2, %v1557_v61, 0 }
 0xb82   : > { %2427 = vmatpush3.bf16.xpose.msra.mxu0 %v1452_v60  ;;  %2428 = vmatprep.mubr.msk.bf16.mxu0 %vm2712_vm0, %v2711_v0 }
 0xb83   : > { %2438 = vmatprep.subr.bf16.mxu0 %v2711_v0 }
 0xb84   : > { %v1667_v63 = vpop.permute.xlu1 %1666 }
 0xb85   : > { %v1672_v1 = vsel %vm530_vm2, %v1667_v63, 0 }
 0xb89   : > { %2429 = vmatmul.mubr.msk.bf16.vlgmr.msra.gmra.mrb[28].mxu0 %vm530_vm2, %v1445_v59 }
 0xb8a   : > { %2439 = vmatpush3.bf16.xpose.msra.mxu0 %v1562_v62  ;;  %2440 = vmatprep.mubr.msk.bf16.mxu0 %vm2712_vm0, %v2711_v0 }
 0xb8b   : > { %2450 = vmatprep.subr.bf16.mxu0 %v2711_v0 }
 0xb91   : > { %2441 = vmatmul.mubr.msk.bf16.vlgmr.msra.gmra.mrb[32].mxu0 %vm530_vm2, %v1555_v3 }
 0xb92   : > { %2451 = vmatpush3.bf16.xpose.msra.mxu0 %v1672_v1  ;;  %2452 = vmatprep.mubr.msk.bf16.mxu0 %vm2712_vm0, %v2711_v0 }
 0xb93   : > { %2462 = vmatprep.subr.bf16.mxu0 %v2711_v0 }
 0xb99   : > { %2453 = vmatmul.mubr.msk.bf16.vlgmr.msra.gmra.mrb[36].mxu0 %vm530_vm2, %v1665_v2 }
 0xb9a   : > { %2466 = vmatprep.mubr.msk.bf16.mxu0 %vm2712_vm0, %v2711_v0 }
 0xc54   : > { %v1378_v4 = vpop.f32.mrb[24].mxu0 }
 0xc55   : > { %v2418_v5 = vpop.f32.mrb[25].mxu0  ;;  %v1384_v6 = vsel %vm530_vm2, %v1378_v4, -inf }
 0xc56   : > { %1385 = vmax.xlane.f32.xlu1 %v1384_v6  ;;  %v1381_v7 = vpop.f32.mrb[26].mxu0 }
 0xc57   : > { %v2419_v8 = vpop.f32.mrb[27].mxu0 }
 0xc5c   : > { %v1488_v9 = vpop.f32.mrb[28].mxu0 }
 0xc5d   : > { %v2430_v11 = vpop.f32.mrb[29].mxu0  ;;  %v1494_v12 = vsel %vm530_vm2, %v1488_v9, -inf }
 0xc5e   : > { %1495 = vmax.xlane.f32.xlu0 %v1494_v12  ;;  %v1491_v10 = vpop.f32.mrb[30].mxu0 }
 0xc5f   : > { %v2431_v13 = vpop.f32.mrb[31].mxu0 }
 0xc64   : > { %v1598_v14 = vpop.f32.mrb[32].mxu0 }
 0xc65   : > { %v2442_v15 = vpop.f32.mrb[33].mxu0  ;;  %v1604_v16 = vsel %vm530_vm2, %v1598_v14, -inf }
 0xc66   : > { %1605 = vmax.xlane.f32.xlu0 %v1604_v16  ;;  %v1601_v17 = vpop.f32.mrb[34].mxu0  ;;  %v2565_v15 = vld [vmem:[%s3295_s3 + $0x18] sm:$0xff]  }
 0xc67   : > { %v2443_v18 = vpop.f32.mrb[35].mxu0 }
 0xc6c   : > { %v1708_v19 = vpop.f32.mrb[36].mxu0 }
 0xc6d   : > { %v2454_v20 = vpop.f32.mrb[37].mxu0  ;;  %v1714_v21 = vsel %vm530_vm2, %v1708_v19, -inf }
 0xc6e   : > { %1715 = vmax.xlane.f32.xlu1 %v1714_v21  ;;  %v1711_v22 = vpop.f32.mrb[38].mxu0 }
 0xc6f   : > { %v2455_v23 = vpop.f32.mrb[39].mxu0 }
 0xce3   : > { %v1386_v24 = vpop.xlane.xlu1 %1385 }
 0xce4   : > { %v1387_v25 = vsub.f32 %v1378_v4, %v1386_v24 }
 0xce6   : > { %v1388_v26 = vmul.f32 1.442695, %v1387_v25 }
 0xce8   : > { %2592 = vpow2.f32 %v1388_v26 }
 0xceb   : > { %v1496_v27 = vpop.xlane.xlu0 %1495 }
 0xcec   : > { %v1497_v28 = vsub.f32 %v1488_v9, %v1496_v27 }
 0xcee   : > { %v1498_v29 = vmul.f32 1.442695, %v1497_v28 }
 0xcf0   : > { %2594 = vpow2.f32 %v1498_v29 }
 0xcf2   : > { %v2593_v30 = vpop.eup %2592 }
 0xcf3   : > { %v1606_v31 = vpop.xlane.xlu0 %1605  ;;  %v1390_v32 = vsel %vm530_vm2, %v2593_v30, 0.0 }
 0xcf4   : > { %v1607_v33 = vsub.f32 %v1598_v14, %v1606_v31  ;;  %1391 = vadd.xlane.f32.xlu0 %v1390_v32  ;;  %v2564_v14 = vld [vmem:[%s3295_s3 + $0x10] sm:$0xff]   ;;  %v2222_v31 = vld [vmem:[%s3296_s4 + $0x1] ss:$0 sm:$0xff] }
 0xcf5   : > { %2463 = vmatpush3.bf16.msra.mxu0 %v2564_v14 }
 0xcf6   : > { %v1608_v34 = vmul.f32 1.442695, %v1607_v33  ;;  %2464 = vmatprep.subr.bf16.mxu0 %v2711_v0 }
 0xcf8   : > { %2596 = vpow2.f32 %v1608_v34 }
 0xcf9   : > { %2465 = vmatpush3.bf16.msra.mxu0 %v2565_v15 }
 0xcfa   : > { %v2595_v35 = vpop.eup %2594  ;;  %2478 = vmatprep.subr.bf16.mxu0 %v2711_v0 }
 0xcfb   : > { %v1500_v36 = vsel %vm530_vm2, %v2595_v35, 0.0  ;;  %v1716_v39 = vpop.xlane.xlu1 %1715 }
 0xcfc   : > { %1501 = vadd.xlane.f32.xlu1 %v1500_v36  ;;  %v1717_v40 = vsub.f32 %v1708_v19, %v1716_v39 }
 0xcfe   : > { %v1718_v41 = vmul.f32 1.442695, %v1717_v40 }
 0xd00   : > { %2598 = vpow2.f32 %v1718_v41 }
 0xd02   : > { %v2597_v37 = vpop.eup %2596 }
 0xd03   : > { %v1610_v38 = vsel %vm530_vm2, %v2597_v37, 0.0 }
 0xd04   : > { %1611 = vadd.xlane.f32.xlu0 %v1610_v38 }
 0xd0a   : > { %v2599_v42 = vpop.eup %2598 }
 0xd0b   : > { %v1720_v43 = vsel %vm530_vm2, %v2599_v42, 0.0 }
 0xd0d   : > { %1506 = vrot.lane.b32.xlu1 %v3101_v54, %s3338_s27  ;;  %s2079_s27 = scalar_lea.sflag [#allocation4], %s2903_s23 }
 0xd1a   : > { %1396 = vrot.lane.b32.xlu0 %v3101_v54, %s3339_s25  ;;  %s2642_s25 = scalar_lea.vmem %s3249_s14, 128 }
 0xd1b   : > { %p2643_p6 = scmp.ne.s32.totalorder %s3249_s14, %s2642_s25 }
 0xd1d   : > { %p2644_p12 = pnand %p2643_p6, %p3346_p11 }
 0xd1e   : > { %1726 = vrot.lane.b32.xlu0 %v3101_v54, %s3340_s17 }
 0xd1f   : > { %p2645_p13 = pneg %p2644_p12 }
 0xd31   : > { %1721 = vadd.xlane.f32.xlu1 %v1720_v43 }
 0xd42   : > { %1616 = vrot.lane.b32.xlu1 %v3101_v54, %s3341_s16 }
 0xd81   : > { %v1392_v44 = vpop.xlane.xlu0 %1391 }
 0xd82   : > { %2600 = vrcp.f32 %v1392_v44  ;;  %v2566_v44 = vld [vmem:[%s3297_s5 + $0x10] sm:$0xff]  }
 0xd89   : > { %v1502_v45 = vpop.xlane.xlu1 %1501 }
 0xd8a   : > { %2602 = vrcp.f32 %v1502_v45  ;;  %v2568_v45 = vld [vmem:[%s3299_s7 + $0x20] sm:$0xff]  }
 0xd8c   : > { %v2601_v46 = vpop.eup %2600 }
 0xd8d   : > { %v1394_v49 = vmul.f32 %v2601_v46, %v2593_v30  ;;  %v1507_v52 = vpop.permute.xlu1 %1506  ;;  %v2569_v46 = vld [vmem:[%s3299_s7 + $0x28] sm:$0xff]  }
 0xd8e   : > { %v1512_v56 = vsel %vm594_vm3, %v1507_v52, 0  ;;  %v2227_v52 = vld [vmem:[%s3301_s9 + $0x1] ss:$0 sm:$0xff] }
 0xd8f   : > { %v1395_v53 = vpack.c.bf16 %v1394_v49, %v1394_v49 }
 0xd91   : > { %v1612_v48 = vpop.xlane.xlu0 %1611 }
 0xd92   : > { %2604 = vrcp.f32 %v1612_v48 }
 0xd94   : > { %v2603_v55 = vpop.eup %2602 }
 0xd95   : > { %v1397_v50 = vpop.permute.xlu0 %1396  ;;  %v1504_v54 = vmul.f32 %v2603_v55, %v2595_v35  ;;  %v2229_v55 = vld [vmem:[%s3302_s10 + $0x1] ss:$0 sm:$0xff] }
 0xd96   : > { %v1402_v51 = vsel %vm594_vm3, %v1397_v50, 0 }
 0xd97   : > { %2421 = vmatpush3.bf16.msra.mxu1 %v1402_v51  ;;  %v1505_v57 = vpack.c.bf16 %v1504_v54, %v1504_v54 }
 0xd98   : > { %2432 = vmatprep.subr.bf16.mxu1 %v2711_v0 }
 0xd99   : > { %v1727_v63 = vpop.permute.xlu0 %1726 }
 0xd9a   : > { %2423 = vmatmul.mubr.msk.bf16.vlgmr.msra.gmra.mrb[28].mxu1 %vm530_vm2, %v1395_v53  ;;  %v1732_v1 = vsel %vm594_vm3, %v1727_v63, 0 }
 0xd9b   : > { %2433 = vmatpush3.bf16.msra.mxu1 %v1512_v56  ;;  %2434 = vmatprep.mubr.msk.bf16.mxu1 %vm2712_vm0, %v2711_v0 }
 0xd9c   : > { %2444 = vmatprep.subr.bf16.mxu1 %v2711_v0  ;;  %v2605_v58 = vpop.eup %2604 }
 0xd9d   : > { %v1614_v60 = vmul.f32 %v2605_v58, %v2597_v37  ;;  %v2570_v58 = vld [vmem:[%s3299_s7 + $0x30] sm:$0xff]  }
 0xd9f   : > { %v1615_v3 = vpack.c.bf16 %v1614_v60, %v1614_v60  ;;  %v2235_v60 = vld [vmem:[%s3298_s6 + $0x1] ss:$0 sm:$0xff] }
 0xda2   : > { %2435 = vmatmul.mubr.msk.bf16.vlgmr.msra.gmra.mrb[32].mxu1 %vm530_vm2, %v1505_v57 }
 0xda3   : > { %2446 = vmatprep.mubr.msk.bf16.mxu1 %vm2712_vm0, %v2711_v0 }
 0xdbe   : > { %v1722_v59 = vpop.xlane.xlu1 %1721 }
 0xdbf   : > { %2606 = vrcp.f32 %v1722_v59  ;;  %v2571_v59 = vld [vmem:[%s3299_s7 + $0x38] sm:$0xff]  }
 0xdc2   : > { %v1617_v61 = vpop.permute.xlu1 %1616 }
 0xdc3   : > { %v1622_v62 = vsel %vm594_vm3, %v1617_v61, 0 }
 0xdc4   : > { %2445 = vmatpush3.bf16.msra.mxu1 %v1622_v62 }
 0xdc5   : > { %2456 = vmatprep.subr.bf16.mxu1 %v2711_v0 }
 0xdc7   : > { %2447 = vmatmul.mubr.msk.bf16.vlgmr.msra.gmra.mrb[36].mxu1 %vm530_vm2, %v1615_v3 }
 0xdc8   : > { %2457 = vmatpush3.bf16.msra.mxu1 %v1732_v1  ;;  %2458 = vmatprep.mubr.msk.bf16.mxu1 %vm2712_vm0, %v2711_v0 }
 0xdc9   : > { %v2607_v2 = vpop.eup %2606  ;;  %2470 = vmatprep.subr.bf16.mxu1 %v2711_v0 }
 0xdca   : > { %v1724_v4 = vmul.f32 %v2607_v2, %v2599_v42 }
 0xdcc   : > { %v1725_v5 = vpack.c.bf16 %v1724_v4, %v1724_v4 }
 0xdcf   : > { %2459 = vmatmul.mubr.msk.bf16.vlgmr.msra.gmra.mrb[40].mxu1 %vm530_vm2, %v1725_v5 }
 0xdd0   : > { %2474 = vmatprep.mubr.msk.bf16.mxu1 %vm2712_vm0, %v2711_v0  ;;  %2471 = vmatpush3.bf16.msra.mxu1 %v2566_v44 }
 0xdd1   : > { %2472 = vmatprep.subr.bf16.mxu1 %v2711_v0 }
 0xe6d   : > { %v1438_v6 = vpop.f32.mrb[28].mxu1 }
 0xe6e   : > { %v2424_v7 = vpop.f32.mrb[29].mxu1 }
 0xe6f   : > { %v1441_v8 = vpop.f32.mrb[30].mxu1 }
 0xe70   : > { %v2425_v9 = vpop.f32.mrb[31].mxu1 }
 0xe75   : > { %v1548_v11 = vpop.f32.mrb[32].mxu1 }
 0xe76   : > { %1775 = vrot.lane.b32.xlu1 %v1548_v11, %s3342_s30  ;;  %v2436_v12 = vpop.f32.mrb[33].mxu1  ;;  %s2259_s30 = sshll.u32 %s2819_s29, 7  ;;  %s2727_s29 = smov [#allocation5]  }
 0xe77   : > { %v1551_v10 = vpop.f32.mrb[34].mxu1  ;;  %s2646_s17 = sshll.u32 %s2727_s29, 4  ;;  %s2647_s17 = int_to_ptr.vmem [resolvable:$false] %s2646_s17 }
 0xe78   : > { %v2437_v13 = vpop.f32.mrb[35].mxu1  ;;  %s2648_s16 = scalar_lea.vmem %s2647_s17, 256  ;;  %p2649_p7 = scmp.lt.s32.totalorder %s3249_s14, %s2647_s17 }
 0xe79   : > { %p2650_p10 = scmp.lt.s32.totalorder %s2648_s16, %s2642_s25 }
 0xe7b   : > { %p2651_p2 = por %p2650_p10, %p2649_p7 }
 0xe7d   : > { %p2652_p4 = pnand %p2651_p2, %p2645_p13 }
 0xe9a   : > { %v1658_v16 = vpop.f32.mrb[36].mxu1 }
 0xe9b   : > { %1779 = vrot.lane.b32.xlu0 %v1658_v16, %s3343_s22  ;;  %v2448_v17 = vpop.f32.mrb[37].mxu1 }
 0xe9c   : > { %v1661_v18 = vpop.f32.mrb[38].mxu1 }
 0xe9d   : > { %v2449_v19 = vpop.f32.mrb[39].mxu1 }
 0xea2   : > { %v1768_v20 = vpop.f32.mrb[40].mxu1 }
 0xea3   : > { %1783 = vrot.lane.b32.xlu1 %v1768_v20, %s3344_s18  ;;  %v2460_v21 = vpop.f32.mrb[41].mxu1  ;;  %s3247_s18 = scalar_lea.hbm %s3305_s13, %s2259_s30 }
 0xea4   : > { %v1771_v22 = vpop.f32.mrb[42].mxu1  ;;  %v2255_v21 = vld [vmem:[%s3303_s11 + $0x1] ss:$0 sm:$0xff] }
 0xea5   : > { %v2461_v23 = vpop.f32.mrb[43].mxu1 }
 0xea6   : > { %v2257_v23 = vld [vmem:[%s3304_s12 + $0x1] ss:$0 sm:$0xff] }
 0xee8   : > { %v1776_v24 = vpop.permute.xlu1 %1775 }
 0xee9   : > { %v1786_v26 = vsel %vm530_vm2, %v1438_v6, %v1776_v24 }
 0xf0d   : > { %v1780_v25 = vpop.permute.xlu0 %1779 }
 0xf0e   : > { %v1787_v27 = vsel %vm981_vm4, %v1786_v26, %v1780_v25 }
 0xf15   : > { %v1784_v28 = vpop.permute.xlu1 %1783 }
 0xf16   : > { %v1788_v29 = vsel %vm983_vm5, %v1787_v27, %v1784_v28 }
 0xf17   : > { %v1789_v30 = vpack.c.bf16 %v1788_v29, %v1788_v29 }
 0xf19   : > { %2467 = vmatmul.mubr.msk.bf16.vlgmr.msra.gmra.mrb[40].mxu0 %vm482_vm1, %v1789_v30 }
 0xf1a   : > { %2486 = vmatprep.mubr.msk.bf16.mxu0 %vm2712_vm0, %v2711_v0  ;;  %2479 = vmatpush3.bf16.msra.mxu0 %v2568_v45 }
 0xf1b   : > { %2480 = vmatprep.subr.bf16.mxu0 %v2711_v0 }
 0xf1e   : > { %2481 = vmatpush3.bf16.msra.mxu0 %v2569_v46 }
 0xf1f   : > { %2482 = vmatprep.subr.bf16.mxu0 %v2711_v0 }
 0xf22   : > { %2483 = vmatpush3.bf16.msra.mxu0 %v2570_v58 }
 0xf23   : > { %2484 = vmatprep.subr.bf16.mxu0 %v2711_v0  ;;  %v2248_v0 = vld [vmem:[%s3300_s8 + $0x1] ss:$0 sm:$0xff] }
 0xf26   : > { %2485 = vmatpush3.bf16.msra.mxu0 %v2571_v59 }
 0xfec   : > { %v1852_v32 = vpop.f32.mrb[40].mxu0 }
 0xfed   : > { %v1853_v33 = vadd.f32 %v2222_v31, %v1852_v32  ;;  %v2468_v34 = vpop.f32.mrb[41].mxu0 }
 0xfee   : > { %v1855_v35 = vpop.f32.mrb[42].mxu0 }
 0xfef   : > { %v2469_v36 = vpop.f32.mrb[43].mxu0  ;;  %v1858_v37 = vadd.f32 %v1853_v33, %v3091_v47  ;;  %v2567_v47 = vld [vmem:[%s3297_s5 + $0x18] sm:$0xff]  }
 0xff0   : > { %2473 = vmatpush3.bf16.msra.mxu1 %v2567_v47 }
 0xff1   : > { %v1859_v38 = vsel %vm482_vm1, %v1858_v37, 0.0 }
 0xff2   : > { %1860 = vadd.xlane.f32.xlu0 %v1859_v38 }
0x107f   : > { %v1861_v39 = vpop.xlane.xlu0 %1860 }
0x1080   : > { %v1862_v40 = vmul.f32 0.03125, %v1861_v39 }
0x1082   : > { %v1863_v41 = vsub.f32 %v1858_v37, %v1862_v40 }
0x1084   : > { %v1864_v42 = vmul.f32 %v1863_v41, %v1863_v41 }
0x1086   : > { %v1865_v43 = vsel %vm482_vm1, %v1864_v42, 0.0 }
0x1087   : > { %1866 = vadd.xlane.f32.xlu1 %v1865_v43 }
0x1114   : > { %v1867_v48 = vpop.xlane.xlu1 %1866 }
0x1115   : > { %v1868_v49 = vmul.f32 0.03125, %v1867_v48 }
0x1117   : > { %v1869_v50 = vadd.f32 1e-05, %v1868_v49 }
0x1119   : > { %2608 = vrsqrt.f32 %v1869_v50 }
0x1123   : > { %v2609_v51 = vpop.eup %2608 }
0x1124   : > { %v1871_v53 = vmul.f32 %v2609_v51, %v1863_v41 }
0x1126   : > { %v1880_v56 = vmul.f32 %v2227_v52, %v1871_v53 }
0x1128   : > { %v1889_v54 = vadd.f32 %v2229_v55, %v1880_v56 }
0x112a   : > { %v1890_v57 = vpack.c.bf16 %v1889_v54, %v1889_v54 }
0x112c   : > { %2475 = vmatmul.mubr.msk.bf16.vlgmr.msra.gmra.mrb[44].mxu1 %vm482_vm1, %v1890_v57 }
0x11ff   : > { %v1953_v61 = vpop.f32.mrb[44].mxu1 }
0x1200   : > { %v1954_v62 = vadd.f32 %v2235_v60, %v1953_v61  ;;  %v2476_v63 = vpop.f32.mrb[45].mxu1 }
0x1201   : > { %v1956_v3 = vpop.f32.mrb[46].mxu1 }
0x1202   : > { %v1959_v1 = vmax.f32 %v1954_v62, 0.0  ;;  %v2477_v2 = vpop.f32.mrb[47].mxu1 }
0x1204   : > { %v1960_v4 = vpack.c.bf16 %v1959_v1, %v1959_v1 }
0x1206   : > { %2487 = vmatmul.mubr.msk.bf16.vlgmr.msra.gmra.mrb[44].mxu0 %vm1191_vm6, %v1960_v4 }
0x12d9   : > { %v2039_v5 = vpop.f32.mrb[44].mxu0 }
0x12da   : > { %v2040_v6 = vadd.f32 %v2248_v0, %v2039_v5  ;;  %v2488_v7 = vpop.f32.mrb[45].mxu0 }
0x12db   : > { %v2042_v8 = vpop.f32.mrb[46].mxu0 }
0x12dc   : > { %v2489_v9 = vpop.f32.mrb[47].mxu0  ;;  %v2045_v11 = vadd.f32 %v2040_v6, %v1889_v54 }
0x12de   : > { %v2046_v12 = vsel %vm482_vm1, %v2045_v11, 0.0 }
0x12df   : > { %2047 = vadd.xlane.f32.xlu0 %v2046_v12 }
0x136c   : > { %v2048_v10 = vpop.xlane.xlu0 %2047 }
0x136d   : > { %v2049_v13 = vmul.f32 0.03125, %v2048_v10 }
0x136f   : > { %v2050_v14 = vsub.f32 %v2045_v11, %v2049_v13 }
0x1371   : > { %v2051_v15 = vmul.f32 %v2050_v14, %v2050_v14 }
0x1373   : > { %v2052_v16 = vsel %vm482_vm1, %v2051_v15, 0.0 }
0x1374   : > { %2053 = vadd.xlane.f32.xlu0 %v2052_v16 }
0x1401   : > { %v2054_v17 = vpop.xlane.xlu0 %2053 }
0x1402   : > { %v2055_v18 = vmul.f32 0.03125, %v2054_v17 }
0x1404   : > { %v2056_v19 = vadd.f32 1e-05, %v2055_v18 }
0x1406   : > { %2610 = vrsqrt.f32 %v2056_v19 }
0x1410   : > { %v2611_v20 = vpop.eup %2610 }
0x1411   : > { %v2058_v22 = vmul.f32 %v2611_v20, %v2050_v14 }
0x1413   : > { %v2067_v24 = vmul.f32 %v2255_v21, %v2058_v22 }
0x1415   : > { %v2076_v25 = vadd.f32 %v2257_v23, %v2067_v24 }
0x1417   : > { %2077 = vst.msk [vmem:[%s455_s15] sm:$0xff] %vm482_vm1, %v2076_v25 }
0x1418   : > { %2655 = shalt.err (!%p2652_p4)
}
0x1419   : > { %s2656_s23 = scalar_lea.hbm %s3247_s18, 128  ;;  %s2660_s15 = scalar_lea.hbm %s3305_s13, 256 }
0x141a   : > { %p2657_p5 = scmp.ne.s32.totalorder %s3247_s18, %s2656_s23  ;;  %p2661_p0 = scmp.lt.u32.totalorder %s3247_s18, %s3305_s13 }
0x141b   : > { %p2662_p1 = scmp.lt.u32.totalorder %s2660_s15, %s2656_s23  ;;  %p2664_p6 = scmp.lt.u32.totalorder %s2656_s23, %s3247_s18 }
0x141c   : > { %p2658_p8 = pnand %p2657_p5, %p3346_p11 }
0x141d   : > { %p2663_p3 = por %p2662_p1, %p2661_p0 }
0x141e   : > { %p2659_p9 = pneg %p2658_p8 }
0x141f   : > { %p2665_p12 = por %p2664_p6, %p2663_p3 }
0x1421   : > { %p2666_p13 = pnand %p2665_p12, %p2659_p9 }
0x1423   : > { %2669 = shalt.err (!%p2666_p13)
}
0x1424   : > { %2492 = dma.vmem_to_hbm [thread:$0]  (%p3346_p11), %s3249_s14, 128, %s3247_s18, %s2079_s27  }
0x1425 PF: > { %s3347_s25 = sld [smem:[#allocation8_spill]]  ;;  %p3348_p7 = scmp.ne.s32.totalorder %s3330_s21, 0 }
0x1426   : > { %p3349_p10 = scmp.ge.s32.totalorder %s2708_s28, 2 }
0x1428   : > { %p2499_p2 = pnand %p3349_p10, %p3348_p7 }
0x142b   : > { %s2104_s29 = sand.u32 1, %s3347_s25  }
0x142c   : > { %s2105_s17 = scalar_lea.sflag [#allocation4], %s2104_s29 }
0x142d   : > { %2691 = dma.done.wait (!%p2499_p2), %s2105_s17, 128  }
0x142e   : > { %2693 = vsyncadd (!%p2499_p2), %s2105_s17, 4294967168  ;;  %s3350_s28 = sld [smem:[#allocation10_spill]]  ;;  %s3351_s16 = sld [smem:[#allocation9_spill]] }
0x142f   : > { %s3352_s27 = sld [smem:[#allocation11_spill]]  ;;  %s3353_s25 = smov %s2700_s26 }
0x1434   : > { %p26_p4 = scmp.ge.s32.totalorder %s3350_s28, 4   ;;  %s3354_s26 = smov %s3351_s16 }
0x1436   :  { %28 = sbr.rel (!%p26_p4) target bundleno = 5 (0x5), region = 129 }
0x143d   :  { %2110 = vsyncpa [#allocation3], 1 }
0x143e   :  { %2112 = vsyncpa [#allocation3 + $0x1], 1 }
0x143f   :  { %2113 = vsyncpa [#allocation4], 1 }
0x1440   :  { %2115 = vsyncpa [#allocation4 + $0x1], 1 }

</bundles_post_ra>
